<compile_context>
chip_gen: v7x
topology: tpu7x:2x2x1
jax: 0.10.0
libtpu: 0.0.40
codegen_flags: <defaults>
</compile_context>

<pallas_src>
import math
import numpy as np
import jax
import jax.numpy as jnp
from jax import lax
from jax.experimental import pallas as pl
from jax.experimental.pallas import tpu as pltpu

SAMPLE_RATE = 16000
KERNEL_SIZE = 251                                   # SincConv_lowpass(251, sr, padding=125)
PADDING = 125
CHUNK = 128                                         # output samples per chunk (lane axis)
N_BAND = -(-(CHUNK + KERNEL_SIZE - 1) // CHUNK)     # 3 input tiles touched by one output chunk
TCH_MAX = 1024                                      # max output chunks (rows) per grid step


def _round_up(x, m):
    return ((x + m - 1) // m) * m


# ---------------------------------------------------------------------------
# filter / banded-weight construction (pure jnp: jittable, no retrace when band_hz changes)
# ---------------------------------------------------------------------------
def make_lowpass_sinc_filter(band_hz, sample_rate=SAMPLE_RATE, kernel_size=KERNEL_SIZE):
    """Windowed-sinc low-pass mirroring SincConv_lowpass (low cutoff 0 Hz, learnable cutoff
    band_hz_ clamped to [20, sr/2] — the clamp also implements .bounding())."""
    cutoff = jnp.clip(jnp.asarray(band_hz, jnp.float32), 20.0, sample_rate / 2)
    half = kernel_size // 2                                                  # 125
    n_lin = jnp.linspace(0.0, kernel_size / 2 - 1, num=kernel_size // 2)     # Hamming half-win
    window = 0.54 - 0.46 * jnp.cos(2.0 * math.pi * n_lin / kernel_size)
    n_ = 2.0 * math.pi * jnp.arange(-half, 0, dtype=jnp.float32) / sample_rate
    bp_left = (jnp.sin(cutoff * n_) / (n_ / 2.0)) * window                   # (125,)
    bp_center = jnp.reshape(2.0 * cutoff, (1,))                              # (1,)
    band_pass = jnp.concatenate([bp_left, bp_center, bp_left[::-1]])         # (251,)
    return (band_pass / (2.0 * cutoff)).astype(jnp.float32)                  # peak-normalized


def make_band_weights(band_hz, dtype=jnp.float32):
    """Shift-invariant banded weight split into 3 tile-bands W_d (CHUNK, CHUNK):
       W_d[s, t] = filt[d*CHUNK + s - t] inside the band, 0 outside, so
       out_chunk[j, t] = sum_d tile[j + d] @ W_d reproduces the stride-1 cross-correlation."""
    filt = make_lowpass_sinc_filter(band_hz)
    s = np.arange(N_BAND * CHUNK)[:, None]
    t = np.arange(CHUNK)[None, :]
    diff = s - t
    mask = jnp.asarray((diff >= 0) & (diff < KERNEL_SIZE))
    idx = np.clip(diff, 0, KERNEL_SIZE - 1)
    w = jnp.where(mask, filt[idx], jnp.float32(0.0))
    return w.astype(dtype).reshape(N_BAND, CHUNK, CHUNK)


# ---------------------------------------------------------------------------
# forward
# ---------------------------------------------------------------------------
def sampling_rate_sinc_forward(x, band_hz=4000.0, w_bands=None, compute_dtype=jnp.float32):
    """Forward of SamplingRateSinc: y = SincConv_lowpass(x), NCW -> NCW.
    compute_dtype=jnp.bfloat16 is the fast path on bf16-native MXUs (accumulation stays f32)."""
    B, C, T = x.shape
    assert C == 1, "SincConv_lowpass is a single-channel 1-D conv"
    out_dtype = x.dtype
    T_out = T + 2 * PADDING - KERNEL_SIZE + 1        # == T for K=251, P=125

    if w_bands is None:
        w_bands = make_band_weights(band_hz, compute_dtype)    # (3, 128, 128)
    else:
        w_bands = w_bands.astype(compute_dtype)

    # ---- tiling: blocks of TCH output chunks, each with a 2-tile input halo ----------------
    n_chunks = -(-T_out // CHUNK)
    tch = min(TCH_MAX, _round_up(n_chunks, 16))      # multiple of 16: safe for bf16 sublanes
    n_blocks = -(-n_chunks // tch)
    if B * n_blocks < 2 and n_chunks > 16:           # keep >=2 grid steps (v7x megacore)
        tch = _round_up(-(-n_chunks // 2), 16)
        n_blocks = -(-n_chunks // tch)
    n_tiles = n_blocks * tch + 2                     # padded-signal tiles incl. final halo
    NB = B * n_blocks

    # one fused XLA pass: cast + pad + blocked-with-halo layout (~1.0-1.06x the signal, not 3x)
    x2 = x[:, 0, :].astype(compute_dtype)
    x_pad = jnp.pad(x2, ((0, 0), (PADDING, n_tiles * CHUNK - PADDING - T)))
    x_tiles = x_pad.reshape(B, n_tiles, CHUNK)
    main = x_tiles[:, :n_blocks * tch].reshape(B, n_blocks, tch, CHUNK)
    halo = jnp.stack([x_tiles[:, tch::tch], x_tiles[:, tch + 1::tch]], axis=2)   # 2 halo tiles
    x_blocks = jnp.concatenate([main, halo], axis=2).reshape(NB, tch + 2, CHUNK)

    prec = (lax.Precision.HIGHEST
            if jnp.dtype(compute_dtype) == jnp.dtype(jnp.float32)
            else lax.Precision.DEFAULT)

    def kernel(x_ref, w_ref, o_ref):
        # x_ref: (1, tch+2, CHUNK) input tiles + halo; w_ref: (3, CHUNK, CHUNK) resident bands.
        # Windows are built in VMEM via 3 shifted slices -> 3 accumulating MXU matmuls.
        acc = jnp.dot(x_ref[0, 0:tch, :], w_ref[0],
                      preferred_element_type=jnp.float32, precision=prec)
        acc = acc + jnp.dot(x_ref[0, 1:tch + 1, :], w_ref[1],
                            preferred_element_type=jnp.float32, precision=prec)
        acc = acc + jnp.dot(x_ref[0, 2:tch + 2, :], w_ref[2],
                            preferred_element_type=jnp.float32, precision=prec)
        o_ref[0] = acc.astype(o_ref.dtype)           # output written directly in x.dtype

    itm_in = jnp.dtype(compute_dtype).itemsize
    itm_out = jnp.dtype(out_dtype).itemsize
    cost = pl.CostEstimate(
        flops=2 * NB * tch * CHUNK * (N_BAND * CHUNK),
        transcendentals=0,
        bytes_accessed=(NB * (tch + 2) * CHUNK * itm_in
                        + N_BAND * CHUNK * CHUNK * itm_in
                        + NB * tch * CHUNK * itm_out))

    out = pl.pallas_call(
        kernel,
        out_shape=jax.ShapeDtypeStruct((NB, tch, CHUNK), out_dtype),
        grid_spec=pltpu.PrefetchScalarGridSpec(
            num_scalar_prefetch=0,
            grid=(NB,),
            in_specs=[pl.BlockSpec((1, tch + 2, CHUNK), lambda i: (i, 0, 0)),
                      pl.BlockSpec((N_BAND, CHUNK, CHUNK), lambda i: (0, 0, 0))],  # resident
            out_specs=pl.BlockSpec((1, tch, CHUNK), lambda i: (i, 0, 0)),
        ),
        compiler_params=pltpu.CompilerParams(dimension_semantics=("parallel",)),
        cost_estimate=cost,
    )(x_blocks, w_bands)

    y = out.reshape(B, n_blocks * tch * CHUNK)[:, :T_out]
    # TODO(synk): add a custom_vjp if gradients w.r.t. x / band_hz are needed for training;
    # the band_hz -> weight construction above is already traced jnp.
    return y[:, None, :]


if __name__ == "__main__":
    fwd = jax.jit(sampling_rate_sinc_forward, static_argnames=("compute_dtype",))
    band_hz = jnp.float32(4000.0)                    # learnable cutoff low_pass.band_hz_ (Hz)

    def numpy_reference(x, band_hz_val):
        # pure-numpy f64 reference of F.conv1d(x, filt[None, None, :], padding=125)
        cutoff = float(np.clip(band_hz_val, 20.0, SAMPLE_RATE / 2))
        half = KERNEL_SIZE // 2
        n_lin = np.linspace(0, KERNEL_SIZE / 2 - 1, num=KERNEL_SIZE // 2)
        window = 0.54 - 0.46 * np.cos(2.0 * math.pi * n_lin / KERNEL_SIZE)
        n_ = 2.0 * math.pi * np.arange(-half, 0, dtype=np.float64) / SAMPLE_RATE
        bp_left = (np.sin(cutoff * n_) / (n_ / 2.0)) * window
        filt = np.concatenate([bp_left, [2.0 * cutoff], bp_left[::-1]]) / (2.0 * cutoff)
        Bn, _, Tn = x.shape
        T_out = Tn + 2 * PADDING - KERNEL_SIZE + 1
        xp = np.pad(np.asarray(x, np.float64)[:, 0, :], ((0, 0), (PADDING, PADDING)))
        ref = np.zeros((Bn, T_out), np.float64)
        for k in range(KERNEL_SIZE):
            ref += filt[k] * xp[:, k:k + T_out]
        return ref

    # 1) f32 path, T a multiple of 128
    B, C, T = 2, 1, 512
    x = jax.random.normal(jax.random.PRNGKey(0), (B, C, T), dtype=jnp.float32)
    y = jax.block_until_ready(fwd(x, band_hz))
    assert y.shape == (B, 1, T)
    np.testing.assert_allclose(np.asarray(y)[:, 0, :], numpy_reference(x, float(band_hz)),
                               rtol=5e-3, atol=5e-3)

    # 2) f32 path, ragged T (not a multiple of 128)
    x_ragged = jax.random.normal(jax.random.PRNGKey(1), (B, C, 500), dtype=jnp.float32)
    y_ragged = jax.block_until_ready(fwd(x_ragged, band_hz))
    np.testing.assert_allclose(np.asarray(y_ragged)[:, 0, :],
                               numpy_reference(x_ragged, float(band_hz)),
                               rtol=5e-3, atol=5e-3)

    # 3) bf16 operands (v6e/v7x fast path), f32 accumulation, output still x.dtype
    y_bf16 = jax.block_until_ready(fwd(x, band_hz, compute_dtype=jnp.bfloat16))
    np.testing.assert_allclose(np.asarray(y_bf16)[:, 0, :], numpy_reference(x, float(band_hz)),
                               rtol=3e-2, atol=5e-2)

    print("KERNEL_OK")
</pallas_src>

<mosaic_0001>
module attributes {stable_mosaic.version = 11 : i64} {
  func.func @kernel(%arg0: i32, %arg1: memref<1x18x128xf32, #tpu.memory_space<vmem>>, %arg2: memref<3x128x128xf32, #tpu.memory_space<vmem>>, %arg3: memref<1x16x128xf32, #tpu.memory_space<vmem>>) attributes {dimension_semantics = [#tpu.dimension_semantics<parallel>], iteration_bounds = array<i64: 2>, scalar_prefetch = 0 : i64, scratch_operands = 0 : i64, tpu.core_type = #tpu.core_type<tc>, window_params = [{transform_indices = @transform_0, window_bounds = array<i64: 1, 18, 128>}, {pipeline_mode = #tpu.pipeline_mode<synchronous>, transform_indices = @transform_1, window_bounds = array<i64: 3, 128, 128>}, {transform_indices = @transform_2, window_bounds = array<i64: 1, 16, 128>}]} {
    %c0 = arith.constant 0 : index
    %c0_0 = arith.constant 0 : index
    %c0_1 = arith.constant 0 : index
    %0 = vector.load %arg1[%c0, %c0_0, %c0_1] : memref<1x18x128xf32, #tpu.memory_space<vmem>>, vector<1x16x128xf32>
    %1 = vector.shape_cast %0 : vector<1x16x128xf32> to vector<16x128xf32>
    %c0_2 = arith.constant 0 : index
    %c0_3 = arith.constant 0 : index
    %c0_4 = arith.constant 0 : index
    %2 = vector.load %arg2[%c0_2, %c0_3, %c0_4] : memref<3x128x128xf32, #tpu.memory_space<vmem>>, vector<1x128x128xf32>
    %3 = vector.shape_cast %2 : vector<1x128x128xf32> to vector<128x128xf32>
    %cst = arith.constant dense<0.000000e+00> : vector<16x128xf32>
    %4 = tpu.matmul %1, %3, %cst {dimension_numbers = #tpu.dot_dimension_numbers<[1], [0], [0], [1], [0, 0, 1, 1], [], []>, precision = #tpu.contract_precision<fp32>} : vector<16x128xf32>, vector<128x128xf32>, vector<16x128xf32> -> vector<16x128xf32>
    %c0_5 = arith.constant 0 : index
    %c1 = arith.constant 1 : index
    %c0_6 = arith.constant 0 : index
    %5 = vector.load %arg1[%c0_5, %c1, %c0_6] : memref<1x18x128xf32, #tpu.memory_space<vmem>>, vector<1x16x128xf32>
    %6 = vector.shape_cast %5 : vector<1x16x128xf32> to vector<16x128xf32>
    %c1_7 = arith.constant 1 : index
    %c0_8 = arith.constant 0 : index
    %c0_9 = arith.constant 0 : index
    %7 = vector.load %arg2[%c1_7, %c0_8, %c0_9] : memref<3x128x128xf32, #tpu.memory_space<vmem>>, vector<1x128x128xf32>
    %8 = vector.shape_cast %7 : vector<1x128x128xf32> to vector<128x128xf32>
    %cst_10 = arith.constant dense<0.000000e+00> : vector<16x128xf32>
    %9 = tpu.matmul %6, %8, %cst_10 {dimension_numbers = #tpu.dot_dimension_numbers<[1], [0], [0], [1], [0, 0, 1, 1], [], []>, precision = #tpu.contract_precision<fp32>} : vector<16x128xf32>, vector<128x128xf32>, vector<16x128xf32> -> vector<16x128xf32>
    %10 = arith.addf %4, %9 : vector<16x128xf32>
    %c0_11 = arith.constant 0 : index
    %c2 = arith.constant 2 : index
    %c0_12 = arith.constant 0 : index
    %11 = vector.load %arg1[%c0_11, %c2, %c0_12] : memref<1x18x128xf32, #tpu.memory_space<vmem>>, vector<1x16x128xf32>
    %12 = vector.shape_cast %11 : vector<1x16x128xf32> to vector<16x128xf32>
    %c2_13 = arith.constant 2 : index
    %c0_14 = arith.constant 0 : index
    %c0_15 = arith.constant 0 : index
    %13 = vector.load %arg2[%c2_13, %c0_14, %c0_15] : memref<3x128x128xf32, #tpu.memory_space<vmem>>, vector<1x128x128xf32>
    %14 = vector.shape_cast %13 : vector<1x128x128xf32> to vector<128x128xf32>
    %cst_16 = arith.constant dense<0.000000e+00> : vector<16x128xf32>
    %15 = tpu.matmul %12, %14, %cst_16 {dimension_numbers = #tpu.dot_dimension_numbers<[1], [0], [0], [1], [0, 0, 1, 1], [], []>, precision = #tpu.contract_precision<fp32>} : vector<16x128xf32>, vector<128x128xf32>, vector<16x128xf32> -> vector<16x128xf32>
    %16 = arith.addf %10, %15 : vector<16x128xf32>
    %c0_17 = arith.constant 0 : index
    %c0_18 = arith.constant 0 : index
    %c0_19 = arith.constant 0 : index
    %17 = vector.load %arg3[%c0_17, %c0_18, %c0_19] : memref<1x16x128xf32, #tpu.memory_space<vmem>>, vector<1x16x128xf32>
    %18 = vector.shape_cast %17 : vector<1x16x128xf32> to vector<16x128xf32>
    %19 = vector.shape_cast %16 : vector<16x128xf32> to vector<1x16x128xf32>
    tpu.vector_store %arg3[%c0_17, %c0_18, %c0_19], %19 {strides = array<i32>} : memref<1x16x128xf32, #tpu.memory_space<vmem>>, vector<1x16x128xf32>,
    return
  }
  func.func @transform_0(%arg0: i32) -> (i32, i32, i32) {
    %c0_i32 = arith.constant 0 : i32
    %c0_i32_0 = arith.constant 0 : i32
    %c0_i32_1 = arith.constant 0 : i32
    return %arg0, %c0_i32, %c0_i32_0 : i32, i32, i32
  }
  func.func @transform_1(%arg0: i32) -> (i32, i32, i32) {
    %c0_i32 = arith.constant 0 : i32
    %c0_i32_0 = arith.constant 0 : i32
    %c0_i32_1 = arith.constant 0 : i32
    %c0_i32_2 = arith.constant 0 : i32
    return %c0_i32, %c0_i32_0, %c0_i32_1 : i32, i32, i32
  }
  func.func @transform_2(%arg0: i32) -> (i32, i32, i32) {
    %c0_i32 = arith.constant 0 : i32
    %c0_i32_0 = arith.constant 0 : i32
    %c0_i32_1 = arith.constant 0 : i32
    return %arg0, %c0_i32, %c0_i32_0 : i32, i32, i32
  }
}

</mosaic_0001>

<bundles_post_ra>
// kernel: sampling_rate_sinc_forward.1
= control target key start
LH: loop header
LB: loop body
LE: loop exit
PB: predicated region body
PF: predicated region fallthrough
CT: control target
= control target key end

     0   :  { %s3950_s9 = smov 0   ;;  %s5151_s0 = inlined_call_operand.vmem [shape: f32[2,18,128], index: 0, kind: input, shape index: {}]   ;;  %s5152_s1 = inlined_call_operand.vmem [shape: f32[3,128,128], index: 1, kind: input, shape index: {}]   ;;  %s5153_s2 = inlined_call_operand.vmem [shape: f32[2,16,128], index: 2, kind: output, shape index: {}]  }
   0x1 LB: > { %s2311_s10 = sadd.s32 4294967295, %s3933_s9   ;;  %p2315_p0 = scmp.ge.s32.totalorder %s3933_s9, 1  ;;  %s3933_s9 = sphi %s3950_s9, %s12_s9  }
   0x2   : > { %p112_p1 = scmp.lt.s32.totalorder %s3933_s9, 3 }
   0x4   : > { %p113_p2 = pnand %p2315_p0, %p112_p1 }
   0x6   : > { %116 = sbr.rel (%p113_p2) target bundleno = 523 (0x20b), region = 28 }
   0xd   : > { %v3961_v0 = vld [vmem:[%s5152_s1 + $0x80] sm:$0xff]  ;;  %v3966_v1 = vld [vmem:[%s5152_s1 + $0x88] sm:$0xff]  ;;  %p3975_p3 = scmp.lt.s32.totalorder %s2311_s10, 1  ;;  %v3990_v7 = vld [vmem:[%s5152_s1 + $0x90] sm:$0xff] }
   0xe   : > { %v3971_v2 = vld [vmem:[%s5152_s1] sm:$0xff]  ;;  %v182_v3 = vand.u32 4294901760, %v3961_v0  ;;  %v185_v4 = vand.u32 4294901760, %v3966_v1  ;;  %v3984_v5 = vld [vmem:[%s5152_s1 + $0x8] sm:$0xff]  ;;  %v3995_v8 = vld [vmem:[%s5152_s1 + $0x98] sm:$0xff]  ;;  %v188_v10 = vand.u32 4294901760, %v3990_v7 }
   0xf   : > { %v866_v6 = vand.u32 4294901760, %v3971_v2  ;;  %v869_v9 = vand.u32 4294901760, %v3984_v5  ;;  %v191_v11 = vand.u32 4294901760, %v3995_v8  ;;  %v4003_v12 = vld [vmem:[%s5152_s1 + $0x10] sm:$0xff]  ;;  %v4008_v13 = vld [vmem:[%s5152_s1 + $0x18] sm:$0xff]  ;;  %v4013_v14 = vld [vmem:[%s5152_s1 + $0xa0] sm:$0xff] }
  0x10   : > { %v4019_v15 = vpack.c.bf16 %v185_v4, %v182_v3  ;;  %v5163_v16 = vand.u32 4294901760, %v4003_v12  ;;  %v5162_v17 = vand.u32 4294901760, %v4008_v13  ;;  %v4026_v18 = vld [vmem:[%s5152_s1 + $0xa8] sm:$0xff]  ;;  %v5172_v19 = vand.u32 4294901760, %v4013_v14  ;;  %v4032_v20 = vld [vmem:[%s5152_s1 + $0x20] sm:$0xff]  ;;  %v4056_v26 = vld [vmem:[%s5152_s1 + $0xb0] sm:$0xff] }
  0x11   : > { %v4037_v21 = vld [vmem:[%s5152_s1 + $0x28] sm:$0xff]  ;;  %v4043_v22 = vpack.c.bf16 %v869_v9, %v866_v6  ;;  %v4049_v23 = vpack.c.bf16 %v191_v11, %v188_v10  ;;  %v5171_v24 = vand.u32 4294901760, %v4026_v18  ;;  %v5161_v25 = vand.u32 4294901760, %v4032_v20  ;;  %v4061_v27 = vld [vmem:[%s5152_s1 + $0xb8] sm:$0xff]  ;;  %s5482_s10 = smov (!%p3975_p3, %s2311_s10), 1  ;;  %v4080_v30 = vld [vmem:[%s5152_s1 + $0x30] sm:$0xff] }
  0x12   : > { %5285 = vst [vmem:[#allocation2_spill] sm:$0xff] %v4019_v15  ;;  %3309 = vmatprep.subr.bf16.mxu1 %v4019_v15  ;;  %v4074_v28 = vpack.c.bf16 %v5162_v17, %v5163_v16  ;;  %v5158_v29 = vand.u32 4294901760, %v4037_v21  ;;  %v4085_v31 = vld [vmem:[%s5152_s1 + $0x38] sm:$0xff]  ;;  %v5166_v33 = vand.u32 4294901760, %v4056_v26  ;;  %v5164_v34 = vand.u32 4294901760, %v4061_v27  ;;  %s3918_s18 = smul.u32 24, %s5482_s10 }
  0x13   : > { %5286 = vst [vmem:[#allocation3_spill] sm:$0xff] %v4049_v23  ;;  %3597 = vmatprep.subr.bf16.mxu0 %v4043_v22  ;;  %3311 = vmatpush3.bf16.msra.mxu1 %v4019_v15  ;;  %v4095_v32 = vpack.c.bf16 %v5171_v24, %v5172_v19  ;;  %v5155_v36 = vand.u32 4294901760, %v4080_v30  ;;  %v5154_v37 = vand.u32 4294901760, %v4085_v31  ;;  %v4112_v38 = vld [vmem:[%s5152_s1 + $0xc0] sm:$0xff]  ;;  %v4117_v39 = vld [vmem:[%s5152_s1 + $0xc8] sm:$0xff]  ;;  %v4149_v46 = vld [vmem:[%s5152_s1 + $0xd0] sm:$0xff]  ;;  %v4181_v55 = vsub.f32 %v3961_v0, %v182_v3 }
  0x14   : > { %3599 = vmatpush3.bf16.msra.mxu0 %v4043_v22  ;;  %3313 = vmatprep.subr.bf16.mxu1 %v4049_v23  ;;  %v4105_v35 = vpack.c.bf16 %v5158_v29, %v5161_v25  ;;  %v4122_v40 = vld [vmem:[%s5152_s1 + $0x40] sm:$0xff]  ;;  %v4127_v41 = vld [vmem:[%s5152_s1 + $0x48] sm:$0xff]  ;;  %s4132_s29 = scalar_lea.vmem %s5151_s0, %s3918_s18  ;;  %v4142_v43 = vpack.c.bf16 %v5164_v34, %v5166_v33  ;;  %v5157_v44 = vand.u32 4294901760, %v4112_v38  ;;  %v5156_v45 = vand.u32 4294901760, %v4117_v39  ;;  %v4164_v51 = vld [vmem:[%s5152_s1 + $0xd8] sm:$0xff]  ;;  %s2353_s7 = sshll.u32 %s5482_s10, 4 }
  0x15   : > { %5287 = vst [vmem:[#allocation4_spill] sm:$0xff] %v4095_v32  ;;  %3601 = vmatprep.subr.bf16.mxu0 %v4074_v28  ;;  %v162_v42 = vld [vmem:[%s4132_s29 + $0x1] sm:$0xff]  ;;  %v4157_v48 = vpack.c.bf16 %v5154_v37, %v5155_v36  ;;  %v5160_v49 = vand.u32 4294901760, %v4122_v40  ;;  %v5159_v50 = vand.u32 4294901760, %v4127_v41  ;;  %v4169_v52 = vld [vmem:[%s5152_s1 + $0x50] sm:$0xff]  ;;  %v4174_v53 = vld [vmem:[%s5152_s1 + $0x58] sm:$0xff]  ;;  %v4186_v56 = vsub.f32 %v3966_v1, %v185_v4  ;;  %s143_s12 = scalar_lea.vmem %s5153_s2, %s2353_s7 }
  0x16   : > { %5288 = vst [vmem:[#allocation5_spill] sm:$0xff] %v4142_v43  ;;  %v144_v47 = vld [vmem:[%s4132_s29] sm:$0xff]  ;;  %v4176_v54 = vand.u32 4294901760, %v162_v42  ;;  %v163_v57 = vld [vmem:[%s4132_s29 + $0x9] sm:$0xff]  ;;  %v5170_v58 = vand.u32 4294901760, %v4149_v46  ;;  %v4207_v62 = vpack.c.bf16 %v5156_v45, %v5157_v44  ;;  %v5167_v63 = vand.u32 4294901760, %v4164_v51 }
  0x17   : > { %3315 = vmatpush3.bf16.msra.mxu1 %v4049_v23  ;;  %5289 = vst [vmem:[#allocation6_spill] sm:$0xff] %v4157_v48  ;;  %v4194_v59 = vld [vmem:[%s5152_s1 + $0xe0] sm:$0xff]  ;;  %v4199_v61 = vand.u32 4294901760, %v144_v47  ;;  %v5169_v0 = vand.u32 4294901760, %v4169_v52  ;;  %v5168_v1 = vand.u32 4294901760, %v4174_v53  ;;  %v4215_v3 = vld [vmem:[%s5152_s1 + $0xe8] sm:$0xff]  ;;  %v4222_v4 = vpack.c.bf16 %v5159_v50, %v5160_v49 }
  0x18   : > { %3603 = vmatpush3.bf16.msra.mxu0 %v4074_v28  ;;  %3317 = vmatprep.subr.bf16.mxu1 %v4095_v32  ;;  %v4197_v60 = vsub.f32 %v162_v42, %v4176_v54  ;;  %5291 = vst [vmem:[#allocation8_spill] sm:$0xff] %v4207_v62  ;;  %v4227_v42 = vld [vmem:[%s5152_s1 + $0x60] sm:$0xff]  ;;  %v4233_v45 = vand.u32 4294901760, %v163_v57  ;;  %v5177_v44 = vand.u32 4294901760, %v4194_v59  ;;  %v4239_v29 = vld [vmem:[%s5152_s1 + $0x68] sm:$0xff]  ;;  %v5175_v50 = vand.u32 4294901760, %v4181_v55 }
  0x19   : > { %3605 = vmatprep.subr.bf16.mxu0 %v4105_v35  ;;  %5290 = vst [vmem:[#allocation7_spill] sm:$0xff] %v4199_v61  ;;  %5292 = vst [vmem:[#allocation9_spill] sm:$0xff] %v4222_v4  ;;  %v4231_v36 = vsub.f32 %v144_v47, %v4199_v61  ;;  %v5174_v49 = vand.u32 4294901760, %v4186_v56  ;;  %v5176_v25 = vand.u32 4294901760, %v4215_v3  ;;  %v4252_v16 = vsub.f32 %v3990_v7, %v188_v10  ;;  %v4272_v10 = vld [vmem:[%s5152_s1 + $0xf0] sm:$0xff]  ;;  %v4277_v33 = vld [vmem:[%s5152_s1 + $0xf8] sm:$0xff] }
  0x1a   : > { %v5165_v37 = vand.u32 4294901760, %v4197_v60  ;;  %v4260_v34 = vpack.c.bf16 %v5167_v63, %v5170_v58  ;;  %v4296_v24 = vsub.f32 %v3971_v2, %v866_v6  ;;  %v4299_v63 = vsub.f32 %v163_v57, %v4233_v45 }
  0x1b   : > { %3319 = vmatpush3.bf16.msra.mxu1 %v4095_v32  ;;  %5293 = vst [vmem:[#allocation10_spill] sm:$0xff] %v4231_v36  ;;  %v5173_v17 = vand.u32 4294901760, %v4231_v36  ;;  %v286_v7 = vsub.f32 %v4181_v55, %v5175_v50  ;;  %v293_v19 = vsub.f32 %v4186_v56, %v5174_v49  ;;  %v4316_v2 = vsub.f32 %v3995_v8, %v191_v11 }
  0x1c   : > { %3607 = vmatpush3.bf16.msra.mxu0 %v4105_v35  ;;  %3321 = vmatprep.subr.bf16.mxu1 %v4142_v43  ;;  %v265_v47 = vsub.f32 %v4197_v60, %v5165_v37  ;;  %5294 = vst [vmem:[#allocation11_spill] sm:$0xff] %v4260_v34  ;;  %v4266_v37 = vpack.c.bf16 %v5168_v1, %v5169_v0  ;;  %v4284_v1 = vld [vmem:[%s5152_s1 + $0x70] sm:$0xff]  ;;  %v4289_v0 = vld [vmem:[%s5152_s1 + $0x78] sm:$0xff]  ;;  %5296 = vst [vmem:[#allocation13_spill] sm:$0xff] %v4296_v24  ;;  %v5299_v50 = vand.u32 4294901760, %v4013_v14 }
  0x1d   : > { %3609 = vmatprep.subr.bf16.mxu0 %v4157_v48  ;;  %3025 = vmatprep.mubr.f32.mxu0 %v5173_v17  ;;  %5297 = vst [vmem:[#allocation14_spill] sm:$0xff] %v4299_v63  ;;  %v145_v17 = vld [vmem:[%s4132_s29 + $0x8] sm:$0xff]  ;;  %v4323_v6 = vpack.c.bf16 %v5176_v25, %v5177_v44  ;;  %v5301_v44 = vand.u32 4294901760, %v4239_v29  ;;  %v5311_v57 = vand.u32 4294901760, %v4284_v1  ;;  %v5314_v36 = vand.u32 4294901760, %v4316_v2 }
  0x1e   : > { %5295 = vst [vmem:[#allocation12_spill] sm:$0xff] %v4266_v37  ;;  %v266_v58 = vand.u32 4294901760, %v265_v47  ;;  %v4310_v47 = vsub.f32 %v3984_v5, %v869_v9  ;;  %v4336_v25 = vsub.f32 %v4013_v14, %v5299_v50  ;;  %v4346_v8 = vand.u32 4294901760, %v145_v17 }
  0x1f   : > { %3323 = vmatpush3.bf16.msra.mxu1 %v4142_v43  ;;  %v5304_v9 = vand.u32 4294901760, %v4026_v18  ;;  %v287_v5 = vand.u32 4294901760, %v286_v7  ;;  %v294_v14 = vand.u32 4294901760, %v293_v19  ;;  %v5308_v7 = vand.u32 4294901760, %v4272_v10 }
  0x20   : > { %3611 = vmatpush3.bf16.msra.mxu0 %v4157_v48  ;;  %3325 = vmatprep.subr.bf16.mxu1 %v4207_v62  ;;  %5298 = vst [vmem:[#allocation15_spill] sm:$0xff] %v4310_v47  ;;  %5303 = vst [vmem:[#allocation17_spill] sm:$0xff] %v4346_v8  ;;  %v5315_v50 = vand.u32 4294901760, %v4299_v63  ;;  %v5333_v23 = vand.u32 4294901760, %v4149_v46 }
  0x21   : > { %3613 = vmatprep.subr.bf16.mxu0 %v4222_v4  ;;  %2710 = vmatprep.mubr.f32.mxu1 %v266_v58  ;;  %v5300_v58 = vand.u32 4294901760, %v4227_v42  ;;  %v4351_v11 = vsub.f32 %v4026_v18, %v5304_v9  ;;  %v5307_v18 = vand.u32 4294901760, %v4061_v27  ;;  %v5309_v9 = vand.u32 4294901760, %v4277_v33 }
  0x23   : > { %3327 = vmatpush3.bf16.msra.mxu1 %v4207_v62  ;;  %v4343_v49 = vpack.c.bf16 %v5301_v44, %v5300_v58  ;;  %v5305_v44 = vand.u32 4294901760, %v4252_v16  ;;  %v5306_v62 = vand.u32 4294901760, %v4056_v26  ;;  %v4368_v19 = vsub.f32 %v4061_v27, %v5307_v18 }
  0x24   : > { %3615 = vmatpush3.bf16.msra.mxu0 %v4222_v4  ;;  %3329 = vmatprep.subr.bf16.mxu1 %v4260_v34  ;;  %v307_v27 = vsub.f32 %v4316_v2, %v5314_v36  ;;  %v5321_v18 = vand.u32 4294901760, %v4032_v20 }
  0x25   : > { %3617 = vmatprep.subr.bf16.mxu0 %v4266_v37  ;;  %5302 = vst [vmem:[#allocation16_spill] sm:$0xff] %v4343_v49  ;;  %v300_v58 = vsub.f32 %v4252_v16, %v5305_v44  ;;  %v4363_v43 = vsub.f32 %v4056_v26, %v5306_v62  ;;  %v4376_v44 = vpack.c.bf16 %v5309_v9, %v5308_v7  ;;  %v5312_v26 = vand.u32 4294901760, %v4289_v0 }
  0x26   : > { %v4393_v7 = vsub.f32 %v145_v17, %v4346_v8  ;;  %v5317_v9 = vand.u32 4294901760, %v4003_v12  ;;  %v4408_v32 = vsub.f32 %v4032_v20, %v5321_v18  ;;  %v5327_v20 = vand.u32 4294901760, %v4336_v25 }
  0x27   : > { %3331 = vmatpush3.bf16.msra.mxu1 %v4260_v34  ;;  %5310 = vst [vmem:[#allocation18_spill] sm:$0xff] %v4376_v44  ;;  %v4382_v62 = vpack.c.bf16 %v5312_v26, %v5311_v57  ;;  %v275_v34 = vsub.f32 %v4299_v63, %v5315_v50  ;;  %v5319_v26 = vand.u32 4294901760, %v4008_v13  ;;  %v5323_v50 = vand.u32 4294901760, %v4037_v21 }
  0x28   : > { %3619 = vmatpush3.bf16.msra.mxu0 %v4266_v37  ;;  %3333 = vmatprep.subr.bf16.mxu1 %v4323_v6  ;;  %5316 = vst [vmem:[#allocation20_spill] sm:$0xff] %v4393_v7  ;;  %v4398_v57 = vsub.f32 %v4003_v12, %v5317_v9  ;;  %5322 = vst [vmem:[#allocation23_spill] sm:$0xff] %v4408_v32  ;;  %v3340_v9 = vpack.c.bf16 %v294_v14, %v287_v5  ;;  %v301_v15 = vand.u32 4294901760, %v300_v58 }
  0x29   : > { %5313 = vst [vmem:[#allocation19_spill] sm:$0xff] %v4382_v62  ;;  %3621 = vmatprep.subr.bf16.mxu0 %v4343_v49  ;;  %v4403_v36 = vsub.f32 %v4008_v13, %v5319_v26  ;;  %v4413_v17 = vsub.f32 %v4037_v21, %v5323_v50  ;;  %v5325_v13 = vand.u32 4294901760, %v4296_v24  ;;  %v5326_v26 = vand.u32 4294901760, %v4310_v47 }
  0x2a   : > { %5318 = vst [vmem:[#allocation21_spill] sm:$0xff] %v4398_v57  ;;  %v314_v18 = vsub.f32 %v4336_v25, %v5327_v20  ;;  %v308_v21 = vand.u32 4294901760, %v307_v27  ;;  %v5328_v50 = vand.u32 4294901760, %v4351_v11  ;;  %v5329_v5 = vand.u32 4294901760, %v4112_v38 }
  0x2b   : > { %5320 = vst [vmem:[#allocation22_spill] sm:$0xff] %v4403_v36  ;;  %5324 = vst [vmem:[#allocation24_spill] sm:$0xff] %v4413_v17  ;;  %3335 = vmatpush3.bf16.msra.mxu1 %v4323_v6  ;;  %v3628_v63 = vpack.c.bf16 %v5326_v26, %v5325_v13  ;;  %v5330_v58 = vand.u32 4294901760, %v4117_v39  ;;  %v276_v26 = vand.u32 4294901760, %v275_v34  ;;  %v5334_v47 = vand.u32 4294901760, %v4164_v51 }
  0x2c   : > { %3623 = vmatpush3.bf16.msra.mxu0 %v4343_v49  ;;  %3337 = vmatprep.subr.bf16.mxu1 %v4376_v44  ;;  %v321_v12 = vsub.f32 %v4351_v11, %v5328_v50  ;;  %v4433_v14 = vsub.f32 %v4112_v38, %v5329_v5  ;;  %v5331_v38 = vand.u32 4294901760, %v4363_v43  ;;  %v4458_v50 = vsub.f32 %v4149_v46, %v5333_v23 }
  0x2d   : > { %v4438_v13 = vsub.f32 %v4117_v39, %v5330_v58  ;;  %3625 = vmatprep.subr.bf16.mxu0 %v4382_v62  ;;  %v5332_v39 = vand.u32 4294901760, %v4368_v19  ;;  %v4463_v27 = vsub.f32 %v4164_v51, %v5334_v47  ;;  %v5335_v34 = vand.u32 4294901760, %v4398_v57 }
  0x2e   : > { %v328_v5 = vsub.f32 %v4363_v43, %v5331_v38  ;;  %v3344_v38 = vpack.c.bf16 %v308_v21, %v301_v15  ;;  %v322_v24 = vand.u32 4294901760, %v321_v12  ;;  %v5336_v20 = vand.u32 4294901760, %v4403_v36 }
  0x2f   : > { %v335_v58 = vsub.f32 %v4368_v19, %v5332_v39  ;;  %3339 = vmatpush3.bf16.msra.mxu1 %v4376_v44  ;;  %v315_v39 = vand.u32 4294901760, %v314_v18  ;;  %v5337_v23 = vand.u32 4294901760, %v4080_v30  ;;  %v5339_v51 = vand.u32 4294901760, %v4085_v31 }
  0x30   : > { %3627 = vmatpush3.bf16.msra.mxu0 %v4382_v62  ;;  %3341 = vmatprep.subr.bf16.mxu1 %v3340_v9  ;;  %v3632_v44 = vpack.c.bf16 %v5336_v20, %v5335_v34  ;;  %v5341_v15 = vand.u32 4294901760, %v4408_v32  ;;  %v5342_v12 = vand.u32 4294901760, %v4413_v17  ;;  %v329_v21 = vand.u32 4294901760, %v328_v5 }
  0x31   : > { %3629 = vmatprep.subr.bf16.mxu0 %v3628_v63  ;;  %v4473_v46 = vsub.f32 %v4080_v30, %v5337_v23  ;;  %v4478_v47 = vsub.f32 %v4085_v31, %v5339_v51  ;;  %v336_v57 = vand.u32 4294901760, %v335_v58  ;;  %v5343_v20 = vand.u32 4294901760, %v4393_v7 }
  0x32   : > { %2711 = vmatmul.mubr.f32.vlgmr.msra.gmra.mrb[0].mxu1 %v276_v26  ;;  %v3636_v18 = vpack.c.bf16 %v5342_v12, %v5341_v15  ;;  %v5344_v30 = vand.u32 4294901760, %v4433_v14  ;;  %v5345_v23 = vand.u32 4294901760, %v4438_v13  ;;  %v5203_v26 = vand.u32 4294901760, %v4458_v50 }
  0x33   : > { %5338 = vst [vmem:[#allocation25_spill] sm:$0xff] %v4473_v46  ;;  %5340 = vst [vmem:[#allocation26_spill] sm:$0xff] %v4478_v47  ;;  %3343 = vmatpush3.bf16.msra.mxu1 %v3340_v9  ;;  %3026 = vmatmul.mubr.f32.vlgmr.msra.gmra.mrb[0].mxu0 %v5343_v20  ;;  %v5202_v51 = vand.u32 4294901760, %v4463_v27  ;;  %v3348_v5 = vpack.c.bf16 %v322_v24, %v315_v39  ;;  %v5346_v9 = vand.u32 4294901760, %v4194_v59  ;;  %v5347_v15 = vand.u32 4294901760, %v4215_v3 }
  0x34   : > { %v342_v34 = vsub.f32 %v4433_v14, %v5344_v30  ;;  %v349_v31 = vsub.f32 %v4438_v13, %v5345_v23  ;;  %3631 = vmatpush3.bf16.msra.mxu0 %v3628_v63  ;;  %3345 = vmatprep.subr.bf16.mxu1 %v3344_v38  ;;  %v5204_v20 = vand.u32 4294901760, %v4473_v46  ;;  %v5348_v23 = vand.u32 4294901760, %v4122_v40 }
  0x35   : > { %v4497_v58 = vsub.f32 %v4194_v59, %v5346_v9  ;;  %v4502_v12 = vsub.f32 %v4215_v3, %v5347_v15  ;;  %3633 = vmatprep.subr.bf16.mxu0 %v3632_v44  ;;  %v5350_v24 = vand.u32 4294901760, %v4127_v41  ;;  %2745 = vmatprep.mubr.f32.mxu1 %v4176_v54  ;;  %v3352_v39 = vpack.c.bf16 %v336_v57, %v329_v21 }
  0x36   : > { %v4509_v63 = vsub.f32 %v4122_v40, %v5348_v23  ;;  %v5352_v3 = vand.u32 4294901760, %v4169_v52  ;;  %v5354_v15 = vand.u32 4294901760, %v4174_v53  ;;  %3060 = vmatprep.mubr.f32.mxu0 %v4199_v61  ;;  %v343_v40 = vand.u32 4294901760, %v342_v34 }
  0x37   : > { %v4514_v59 = vsub.f32 %v4127_v41, %v5350_v24  ;;  %3347 = vmatpush3.bf16.msra.mxu1 %v3344_v38  ;;  %v350_v23 = vand.u32 4294901760, %v349_v31  ;;  %v356_v41 = vsub.f32 %v4458_v50, %v5203_v26  ;;  %v363_v57 = vsub.f32 %v4463_v27, %v5202_v51 }
  0x38   : > { %5349 = vst [vmem:[#allocation27_spill] sm:$0xff] %v4509_v63  ;;  %v4520_v9 = vsub.f32 %v4169_v52, %v5352_v3  ;;  %v4525_v30 = vsub.f32 %v4174_v53, %v5354_v15  ;;  %3635 = vmatpush3.bf16.msra.mxu0 %v3632_v44  ;;  %3349 = vmatprep.subr.bf16.mxu1 %v3348_v5  ;;  %v5205_v52 = vand.u32 4294901760, %v4497_v58  ;;  %v5356_v21 = vand.u32 4294901760, %v4272_v10 }
  0x39   : > { %5351 = vst [vmem:[#allocation28_spill] sm:$0xff] %v4514_v59  ;;  %v5357_v34 = vand.u32 4294901760, %v4277_v33  ;;  %3637 = vmatprep.subr.bf16.mxu0 %v3636_v18  ;;  %v5358_v44 = vand.u32 4294901760, %v4478_v47  ;;  %v5207_v3 = vand.u32 4294901760, %v4509_v63  ;;  %v5206_v15 = vand.u32 4294901760, %v4514_v59 }
  0x3a   : > { %5353 = vst [vmem:[#allocation29_spill] sm:$0xff] %v4520_v9  ;;  %5355 = vst [vmem:[#allocation30_spill] sm:$0xff] %v4525_v30  ;;  %v4539_v38 = vsub.f32 %v4272_v10, %v5356_v21  ;;  %v3356_v10 = vpack.c.bf16 %v350_v23, %v343_v40  ;;  %v357_v21 = vand.u32 4294901760, %v356_v41  ;;  %v364_v26 = vand.u32 4294901760, %v363_v57 }
  0x3b   : > { %v4544_v31 = vsub.f32 %v4277_v33, %v5357_v34  ;;  %v3640_v24 = vpack.c.bf16 %v5358_v44, %v5204_v20  ;;  %3351 = vmatpush3.bf16.msra.mxu1 %v3348_v5  ;;  %v5210_v53 = vand.u32 4294901760, %v4525_v30  ;;  %v370_v33 = vsub.f32 %v4497_v58, %v5205_v52 }
  0x3c   : > { %3639 = vmatpush3.bf16.msra.mxu0 %v3636_v18  ;;  %3353 = vmatprep.subr.bf16.mxu1 %v3352_v39  ;;  %v5359_v34 = vand.u32 4294901760, %v4502_v12  ;;  %v383_v20 = vand.u32 4294901760, %v4539_v38  ;;  %v3644_v5 = vpack.c.bf16 %v5206_v15, %v5207_v3  ;;  %v5360_v18 = vand.u32 4294901760, %v4227_v42 }
  0x3d   : > { %v390_v51 = vand.u32 4294901760, %v4544_v31  ;;  %3641 = vmatprep.subr.bf16.mxu0 %v3640_v24  ;;  %v5362_v23 = vand.u32 4294901760, %v4239_v29  ;;  %v3360_v57 = vpack.c.bf16 %v364_v26, %v357_v21  ;;  %v371_v15 = vand.u32 4294901760, %v370_v33 }
  0x3e   : > { %v377_v44 = vsub.f32 %v4502_v12, %v5359_v34  ;;  %v4569_v40 = vsub.f32 %v4227_v42, %v5360_v18  ;;  %v5364_v34 = vand.u32 4294901760, %v4520_v9  ;;  %v384_v59 = vsub.f32 %v4539_v38, %v383_v20 }
  0x3f   : > { %v4574_v41 = vsub.f32 %v4239_v29, %v5362_v23  ;;  %3355 = vmatpush3.bf16.msra.mxu1 %v3352_v39  ;;  %v391_v42 = vsub.f32 %v4544_v31, %v390_v51  ;;  %v5365_v26 = vand.u32 4294901760, %v4284_v1  ;;  %v5367_v21 = vand.u32 4294901760, %v4289_v0 }
  0x40   : > { %5361 = vst [vmem:[#allocation31_spill] sm:$0xff] %v4569_v40  ;;  %v3648_v52 = vpack.c.bf16 %v5210_v53, %v5364_v34  ;;  %3643 = vmatpush3.bf16.msra.mxu0 %v3640_v24  ;;  %3357 = vmatprep.subr.bf16.mxu1 %v3356_v10  ;;  %v378_v3 = vand.u32 4294901760, %v377_v44  ;;  %v5369_v33 = vand.u32 4294901760, %v4181_v55  ;;  %v5370_v44 = vand.u32 4294901760, %v4186_v56 }
  0x41   : > { %5363 = vst [vmem:[#allocation32_spill] sm:$0xff] %v4574_v41  ;;  %3645 = vmatprep.subr.bf16.mxu0 %v3644_v5  ;;  %v4587_v39 = vsub.f32 %v4284_v1, %v5365_v26  ;;  %v4592_v24 = vsub.f32 %v4289_v0, %v5367_v21  ;;  %v385_v53 = vand.u32 4294901760, %v384_v59  ;;  %v392_v29 = vand.u32 4294901760, %v391_v42 }
  0x42   : > { %v4598_v23 = vpack.c.bf16 %v5370_v44, %v5369_v33  ;;  %v3364_v34 = vpack.c.bf16 %v378_v3, %v371_v15  ;;  %v5371_v1 = vand.u32 4294901760, %v4252_v16  ;;  %v5372_v26 = vand.u32 4294901760, %v4316_v2 }
  0x43   : > { %5366 = vst [vmem:[#allocation33_spill] sm:$0xff] %v4587_v39  ;;  %5368 = vst [vmem:[#allocation34_spill] sm:$0xff] %v4592_v24  ;;  %3359 = vmatpush3.bf16.msra.mxu1 %v3356_v10  ;;  %v5373_v0 = vand.u32 4294901760, %v4569_v40  ;;  %v5374_v21 = vand.u32 4294901760, %v4574_v41  ;;  %v5214_v33 = vand.u32 4294901760, %v4587_v39  ;;  %v5213_v10 = vand.u32 4294901760, %v4592_v24 }
  0x44   : > { %3647 = vmatpush3.bf16.msra.mxu0 %v3644_v5  ;;  %3361 = vmatprep.subr.bf16.mxu1 %v3360_v57  ;;  %v4604_v18 = vpack.c.bf16 %v5372_v26, %v5371_v1  ;;  %v5375_v3 = vand.u32 4294901760, %v4336_v25  ;;  %v5376_v59 = vand.u32 4294901760, %v4351_v11  ;;  %v3368_v5 = vpack.c.bf16 %v392_v29, %v385_v53  ;;  %v1550_v41 = vld [vmem:[%s4132_s29 + $0xa] sm:$0xff] }
  0x45   : > { %3649 = vmatprep.subr.bf16.mxu0 %v3648_v52  ;;  %v3652_v30 = vpack.c.bf16 %v5374_v21, %v5373_v0  ;;  %v3656_v42 = vpack.c.bf16 %v5213_v10, %v5214_v33  ;;  %v5377_v44 = vand.u32 4294901760, %v4363_v43  ;;  %v5378_v1 = vand.u32 4294901760, %v4368_v19  ;;  %v2344_v33 = vld [vmem:[%s5152_s1 + $0x148] sm:$0xff] }
  0x46   : > { %v4616_v15 = vpack.c.bf16 %v5376_v59, %v5375_v3  ;;  %v5379_v53 = vand.u32 4294901760, %v4433_v14  ;;  %v5382_v0 = vand.u32 4294901760, %v4463_v27  ;;  %v3380_v59 = vpack.c.bf16 %v4351_v11, %v4336_v25  ;;  %v1549_v11 = vld [vmem:[%s4132_s29 + $0x2] sm:$0xff] }
  0x47   : > { %3363 = vmatpush3.bf16.msra.mxu1 %v3360_v57  ;;  %v4626_v26 = vpack.c.bf16 %v5378_v1, %v5377_v44  ;;  %v5380_v57 = vand.u32 4294901760, %v4438_v13  ;;  %v3388_v25 = vpack.c.bf16 %v4438_v13, %v4433_v14  ;;  %v2335_v14 = vld [vmem:[%s5152_s1 + $0x100] sm:$0xff]  ;;  %v2336_v13 = vld [vmem:[%s5152_s1 + $0x108] sm:$0xff] }
  0x48   : > { %3651 = vmatpush3.bf16.msra.mxu0 %v3648_v52  ;;  %3365 = vmatprep.subr.bf16.mxu1 %v3364_v34  ;;  %v3372_v52 = vpack.c.bf16 %v4186_v56, %v4181_v55  ;;  %v5383_v55 = vand.u32 4294901760, %v4497_v58  ;;  %v5384_v56 = vand.u32 4294901760, %v4502_v12 }
  0x49   : > { %3653 = vmatprep.subr.bf16.mxu0 %v3652_v30  ;;  %v4634_v29 = vpack.c.bf16 %v5380_v57, %v5379_v53  ;;  %v2339_v53 = vld [vmem:[%s5152_s1 + $0x120] sm:$0xff]  ;;  %v2340_v57 = vld [vmem:[%s5152_s1 + $0x128] sm:$0xff] }
  0x4a   : > { %v4648_v3 = vpack.c.bf16 %v5384_v56, %v5383_v55 }
  0x4b   : > { %3367 = vmatpush3.bf16.msra.mxu1 %v3364_v34  ;;  %v5381_v34 = vand.u32 4294901760, %v4458_v50 }
  0x4c   : > { %3655 = vmatpush3.bf16.msra.mxu0 %v3652_v30  ;;  %3369 = vmatprep.subr.bf16.mxu1 %v3368_v5  ;;  %v3376_v30 = vpack.c.bf16 %v4316_v2, %v4252_v16  ;;  %v4656_v16 = vpack.c.bf16 %v390_v51, %v383_v20  ;;  %v3384_v2 = vpack.c.bf16 %v4368_v19, %v4363_v43  ;;  %v4674_v43 = vand.u32 4294901760, %v1549_v11  ;;  %v2337_v20 = vld [vmem:[%s5152_s1 + $0x110] sm:$0xff] }
  0x4d   : > { %3657 = vmatprep.subr.bf16.mxu0 %v3656_v42  ;;  %v4640_v21 = vpack.c.bf16 %v5382_v0, %v5381_v34  ;;  %v3392_v51 = vpack.c.bf16 %v4463_v27, %v4458_v50  ;;  %v3396_v19 = vpack.c.bf16 %v4502_v12, %v4497_v58  ;;  %v3400_v50 = vpack.c.bf16 %v4544_v31, %v4539_v38 }
  0x4e   : > { %v4687_v27 = vsub.f32 %v1549_v11, %v4674_v43  ;;  %v1569_v58 = vand.u32 4294901760, %v2335_v14  ;;  %v1572_v12 = vand.u32 4294901760, %v2336_v13  ;;  %v1575_v38 = vand.u32 4294901760, %v2337_v20 }
  0x4f   : > { %3371 = vmatpush3.bf16.msra.mxu1 %v3368_v5  ;;  %v2338_v5 = vld [vmem:[%s5152_s1 + $0x118] sm:$0xff] }
  0x50   : > { %3659 = vmatpush3.bf16.msra.mxu0 %v3656_v42  ;;  %3373 = vmatprep.subr.bf16.mxu1 %v3372_v52  ;;  %v5215_v42 = vand.u32 4294901760, %v4687_v27  ;;  %v4700_v44 = vsub.f32 %v2335_v14, %v1569_v58  ;;  %v4702_v1 = vsub.f32 %v2336_v13, %v1572_v12  ;;  %v1578_v31 = vand.u32 4294901760, %v2338_v5  ;;  %v2342_v14 = vld [vmem:[%s5152_s1 + $0x138] sm:$0xff] }
  0x51   : > { %3661 = vmatprep.subr.bf16.mxu0 %v4043_v22  ;;  %v4714_v34 = vsub.f32 %v2337_v20, %v1575_v38  ;;  %v1590_v10 = vand.u32 4294901760, %v2342_v14 }
  0x52   : > { %2746 = vmatmul.mubr.f32.vlgmr.msra.gmra.mrb[0].mxu1 %v4233_v45  ;;  %v1652_v0 = vsub.f32 %v4687_v27, %v5215_v42  ;;  %v5216_v55 = vand.u32 4294901760, %v4702_v1  ;;  %v4721_v56 = vsub.f32 %v2338_v5, %v1578_v31  ;;  %v5391_v42 = vand.u32 4294901760, %v4197_v60 }
  0x53   : > { %3375 = vmatpush3.bf16.msra.mxu1 %v3372_v52  ;;  %3061 = vmatmul.mubr.f32.vlgmr.msra.gmra.mrb[0].mxu0 %v4346_v8  ;;  %v4706_v52 = vpack.c.bf16 %v1572_v12, %v1569_v58  ;;  %v5218_v13 = vand.u32 4294901760, %v4714_v34  ;;  %v5405_v32 = vand.u32 4294901760, %v4702_v1 }
  0x54   : > { %3663 = vmatpush3.bf16.msra.mxu0 %v4043_v22  ;;  %3377 = vmatprep.subr.bf16.mxu1 %v3376_v30  ;;  %v1653_v58 = vand.u32 4294901760, %v1652_v0  ;;  %v5217_v12 = vand.u32 4294901760, %v4721_v56 }
  0x55   : > { %3665 = vmatprep.subr.bf16.mxu0 %v4074_v28  ;;  %2780 = vmatprep.mubr.f32.mxu1 %v4197_v60  ;;  %v1680_v7 = vsub.f32 %v4702_v1, %v5405_v32 }
  0x56   : > { %3095 = vmatprep.mubr.f32.mxu0 %v4199_v61  ;;  %v4755_v0 = vpack.c.bf16 %v5217_v12, %v5218_v13 }
  0x57   : > { %3379 = vmatpush3.bf16.msra.mxu1 %v3376_v30  ;;  %v5219_v30 = vand.u32 4294901760, %v4700_v44 }
  0x58   : > { %3667 = vmatpush3.bf16.msra.mxu0 %v4074_v28  ;;  %3381 = vmatprep.subr.bf16.mxu1 %v3380_v59 }
  0x59   : > { %3669 = vmatprep.subr.bf16.mxu0 %v4105_v35  ;;  %v4729_v11 = vpack.c.bf16 %v5216_v55, %v5219_v30 }
  0x5b   : > { %3383 = vmatpush3.bf16.msra.mxu1 %v3380_v59  ;;  %v5385_v59 = vld [vmem:[#allocation2_spill] sm:$0xff] }
  0x5c   : > { %3671 = vmatpush3.bf16.msra.mxu0 %v4105_v35  ;;  %3385 = vmatprep.subr.bf16.mxu1 %v3384_v2  ;;  %5386 = vst [vmem:[#allocation2_spill] sm:$0xff] %v4729_v11  ;;  %v2350_v11 = vld [vmem:[%s5152_s1 + $0x178] sm:$0xff] }
  0x5d   : > { %3673 = vmatprep.subr.bf16.mxu0 %v4157_v48 }
  0x5f   : > { %3387 = vmatpush3.bf16.msra.mxu1 %v3384_v2  ;;  %v1581_v2 = vand.u32 4294901760, %v2339_v53 }
  0x60   : > { %3675 = vmatpush3.bf16.msra.mxu0 %v4157_v48  ;;  %3389 = vmatprep.subr.bf16.mxu1 %v3388_v25 }
  0x61   : > { %3677 = vmatprep.subr.bf16.mxu0 %v4222_v4  ;;  %v4743_v20 = vsub.f32 %v2339_v53, %v1581_v2 }
  0x63   : > { %3391 = vmatpush3.bf16.msra.mxu1 %v3388_v25  ;;  %v1584_v25 = vand.u32 4294901760, %v2340_v57  ;;  %v5226_v55 = vand.u32 4294901760, %v4743_v20 }
  0x64   : > { %3679 = vmatpush3.bf16.msra.mxu0 %v4222_v4  ;;  %3393 = vmatprep.subr.bf16.mxu1 %v3392_v51 }
  0x65   : > { %3681 = vmatprep.subr.bf16.mxu0 %v4266_v37  ;;  %v4745_v5 = vsub.f32 %v2340_v57, %v1584_v25  ;;  %v4758_v53 = vpack.c.bf16 %v1584_v25, %v1581_v2  ;;  %v2343_v57 = vld [vmem:[%s5152_s1 + $0x140] sm:$0xff]  ;;  %v4772_v2 = vsub.f32 %v2342_v14, %v1590_v10  ;;  %v5392_v25 = vld [vmem:[#allocation4_spill] sm:$0xff]  ;;  %v2346_v14 = vld [vmem:[%s5152_s1 + $0x158] sm:$0xff] }
  0x66   : > { %v1593_v30 = vand.u32 4294901760, %v2343_v57 }
  0x67   : > { %3395 = vmatpush3.bf16.msra.mxu1 %v3392_v51  ;;  %v4732_v51 = vpack.c.bf16 %v1578_v31, %v1575_v38  ;;  %v5388_v38 = vld [vmem:[#allocation3_spill] sm:$0xff]  ;;  %v5225_v12 = vand.u32 4294901760, %v4745_v5  ;;  %v5236_v24 = vand.u32 4294901760, %v4772_v2 }
  0x68   : > { %3683 = vmatpush3.bf16.msra.mxu0 %v4266_v37  ;;  %3397 = vmatprep.subr.bf16.mxu1 %v3396_v19  ;;  %5390 = vst [vmem:[#allocation3_spill] sm:$0xff] %v4758_v53  ;;  %v4794_v39 = vsub.f32 %v2343_v57, %v1593_v30 }
  0x69   : > { %3685 = vmatprep.subr.bf16.mxu0 %v4343_v49  ;;  %v4781_v60 = vpack.c.bf16 %v5225_v12, %v5226_v55  ;;  %v1602_v55 = vand.u32 4294901760, %v2346_v14 }
  0x6a   : > { %v5249_v9 = vand.u32 4294901760, %v4794_v39 }
  0x6b   : > { %3399 = vmatpush3.bf16.msra.mxu1 %v3396_v19  ;;  %v2341_v19 = vld [vmem:[%s5152_s1 + $0x130] sm:$0xff]  ;;  %5393 = vst [vmem:[#allocation4_spill] sm:$0xff] %v4781_v60  ;;  %v2348_v60 = vld [vmem:[%s5152_s1 + $0x168] sm:$0xff] }
  0x6c   : > { %3687 = vmatpush3.bf16.msra.mxu0 %v4343_v49  ;;  %3401 = vmatprep.subr.bf16.mxu1 %v3400_v50  ;;  %v1587_v31 = vand.u32 4294901760, %v2341_v19 }
  0x6d   : > { %3689 = vmatprep.subr.bf16.mxu0 %v4382_v62 }
  0x6e   : > { %v4770_v13 = vsub.f32 %v2341_v19, %v1587_v31  ;;  %v2345_v19 = vld [vmem:[%s5152_s1 + $0x150] sm:$0xff] }
  0x6f   : > { %3403 = vmatpush3.bf16.msra.mxu1 %v3400_v50  ;;  %v5387_v50 = vld [vmem:[#allocation14_spill] sm:$0xff] }
  0x70   : > { %3691 = vmatpush3.bf16.msra.mxu0 %v4382_v62  ;;  %3405 = vmatprep.subr.bf16.mxu1 %v5385_v59  ;;  %5389 = vst [vmem:[#allocation14_spill] sm:$0xff] %v4755_v0 }
  0x71   : > { %3693 = vmatprep.subr.bf16.mxu0 %v4706_v52 }
  0x72   : > { %2781 = vmatmul.mubr.f32.vlgmr.msra.gmra.mrb[0].mxu1 %v5387_v50 }
  0x73   : > { %3407 = vmatpush3.bf16.msra.mxu1 %v5385_v59  ;;  %3096 = vmatmul.mubr.f32.vlgmr.msra.gmra.mrb[0].mxu0 %v4346_v8  ;;  %v1596_v8 = vand.u32 4294901760, %v2344_v33 }
  0x74   : > { %3695 = vmatpush3.bf16.msra.mxu0 %v4706_v52  ;;  %3409 = vmatprep.subr.bf16.mxu1 %v5388_v38 }
  0x75   : > { %3697 = vmatprep.subr.bf16.mxu0 %v4732_v51  ;;  %2815 = vmatprep.mubr.f32.mxu1 %v5391_v42  ;;  %v4784_v42 = vpack.c.bf16 %v1590_v10, %v1587_v31  ;;  %v4796_v12 = vsub.f32 %v2344_v33, %v1596_v8  ;;  %v5395_v10 = vld [vmem:[#allocation5_spill] sm:$0xff]  ;;  %v1599_v31 = vand.u32 4294901760, %v2345_v19  ;;  %v4809_v57 = vpack.c.bf16 %v1596_v8, %v1593_v30  ;;  %v2347_v33 = vld [vmem:[%s5152_s1 + $0x160] sm:$0xff]  ;;  %v5398_v30 = vld [vmem:[#allocation8_spill] sm:$0xff] }
  0x76   : > { %3130 = vmatprep.mubr.f32.mxu0 %v1653_v58  ;;  %v5237_v58 = vand.u32 4294901760, %v4770_v13  ;;  %v4824_v8 = vand.u32 4294901760, %v1550_v41 }
  0x77   : > { %3411 = vmatpush3.bf16.msra.mxu1 %v5388_v38  ;;  %5394 = vst [vmem:[#allocation35_spill] sm:$0xff] %v4784_v42  ;;  %5397 = vst [vmem:[#allocation36_spill] sm:$0xff] %v4809_v57  ;;  %v5248_v61 = vand.u32 4294901760, %v4796_v12  ;;  %v4819_v0 = vsub.f32 %v2345_v19, %v1599_v31  ;;  %v4835_v19 = vpack.c.bf16 %v1602_v55, %v1599_v31  ;;  %v5401_v31 = vld [vmem:[#allocation11_spill] sm:$0xff] }
  0x78   : > { %3699 = vmatpush3.bf16.msra.mxu0 %v4732_v51  ;;  %3413 = vmatprep.subr.bf16.mxu1 %v5392_v25  ;;  %v4806_v40 = vpack.c.bf16 %v5236_v24, %v5237_v58  ;;  %v4821_v24 = vsub.f32 %v2346_v14, %v1602_v55  ;;  %v1605_v58 = vand.u32 4294901760, %v2347_v33  ;;  %v2349_v14 = vld [vmem:[%s5152_s1 + $0x170] sm:$0xff]  ;;  %v4851_v55 = vsub.f32 %v1550_v41, %v4824_v8 }
  0x79   : > { %3701 = vmatprep.subr.bf16.mxu0 %v4758_v53  ;;  %v4832_v63 = vpack.c.bf16 %v5248_v61, %v5249_v9  ;;  %5400 = vst [vmem:[#allocation37_spill] sm:$0xff] %v4835_v19  ;;  %v5264_v47 = vand.u32 4294901760, %v4819_v0  ;;  %v1611_v9 = vand.u32 4294901760, %v2349_v14 }
  0x7a   : > { %5396 = vst [vmem:[#allocation5_spill] sm:$0xff] %v4806_v40  ;;  %v1608_v40 = vand.u32 4294901760, %v2348_v60  ;;  %v5263_v46 = vand.u32 4294901760, %v4821_v24  ;;  %v4845_v62 = vsub.f32 %v2347_v33, %v1605_v58  ;;  %v5404_v33 = vand.u32 4294901760, %v4700_v44 }
  0x7b   : > { %3415 = vmatpush3.bf16.msra.mxu1 %v5392_v25  ;;  %5399 = vst [vmem:[#allocation8_spill] sm:$0xff] %v4832_v63  ;;  %v1614_v63 = vand.u32 4294901760, %v2350_v11  ;;  %v4872_v37 = vsub.f32 %v2349_v14, %v1611_v9  ;;  %v1681_v14 = vand.u32 4294901760, %v1680_v7  ;;  %v5410_v7 = vld [vmem:[#allocation18_spill] sm:$0xff] }
  0x7c   : > { %3703 = vmatpush3.bf16.msra.mxu0 %v4758_v53  ;;  %3417 = vmatprep.subr.bf16.mxu1 %v5395_v10  ;;  %v4847_v61 = vsub.f32 %v2348_v60, %v1608_v40  ;;  %v4859_v17 = vpack.c.bf16 %v5263_v46, %v5264_v47  ;;  %v4862_v60 = vpack.c.bf16 %v1608_v40, %v1605_v58  ;;  %v5267_v36 = vand.u32 4294901760, %v4845_v62 }
  0x7d   : > { %3705 = vmatprep.subr.bf16.mxu0 %v4784_v42  ;;  %v1673_v41 = vsub.f32 %v4700_v44, %v5404_v33  ;;  %v4874_v46 = vsub.f32 %v2350_v11, %v1614_v63  ;;  %v4880_v58 = vpack.c.bf16 %v1614_v63, %v1611_v9  ;;  %v5407_v33 = vand.u32 4294901760, %v4714_v34 }
  0x7e   : > { %5402 = vst [vmem:[#allocation11_spill] sm:$0xff] %v4859_v17  ;;  %5403 = vst [vmem:[#allocation38_spill] sm:$0xff] %v4862_v60  ;;  %v5266_v49 = vand.u32 4294901760, %v4847_v61  ;;  %v5408_v40 = vand.u32 4294901760, %v4721_v56  ;;  %v1770_v63 = vand.u32 4294901760, %v4872_v37  ;;  %v5415_v53 = vand.u32 4294901760, %v4772_v2 }
  0x7f   : > { %3419 = vmatpush3.bf16.msra.mxu1 %v5395_v10  ;;  %v1674_v11 = vand.u32 4294901760, %v1673_v41  ;;  %v1687_v47 = vsub.f32 %v4714_v34, %v5407_v33  ;;  %v1777_v9 = vand.u32 4294901760, %v4874_v46  ;;  %v5411_v41 = vand.u32 4294901760, %v4743_v20 }
  0x80   : > { %3707 = vmatpush3.bf16.msra.mxu0 %v4784_v42  ;;  %3421 = vmatprep.subr.bf16.mxu1 %v5398_v30  ;;  %v4886_v32 = vpack.c.bf16 %v5266_v49, %v5267_v36  ;;  %v1694_v17 = vsub.f32 %v4721_v56, %v5408_v40  ;;  %v5409_v49 = vand.u32 4294901760, %v4851_v55  ;;  %v5412_v40 = vand.u32 4294901760, %v4745_v5 }
  0x81   : > { %3709 = vmatprep.subr.bf16.mxu0 %v4809_v57  ;;  %v1701_v33 = vsub.f32 %v4743_v20, %v5411_v41  ;;  %v1688_v4 = vand.u32 4294901760, %v1687_v47  ;;  %v1722_v47 = vsub.f32 %v4772_v2, %v5415_v53 }
  0x82   : > { %5406 = vst [vmem:[#allocation39_spill] sm:$0xff] %v4886_v32  ;;  %v1662_v36 = vsub.f32 %v4851_v55, %v5409_v49  ;;  %v1708_v32 = vsub.f32 %v4745_v5, %v5412_v40  ;;  %v1695_v42 = vand.u32 4294901760, %v1694_v17  ;;  %v5414_v40 = vand.u32 4294901760, %v4770_v13 }
  0x83   : > { %3423 = vmatpush3.bf16.msra.mxu1 %v5398_v30  ;;  %v5416_v17 = vand.u32 4294901760, %v5387_v50 }
  0x84   : > { %3711 = vmatpush3.bf16.msra.mxu0 %v4809_v57  ;;  %3425 = vmatprep.subr.bf16.mxu1 %v5401_v31  ;;  %v3724_v57 = vpack.c.bf16 %v1681_v14, %v1674_v11  ;;  %v1663_v49 = vand.u32 4294901760, %v1662_v36  ;;  %v1709_v41 = vand.u32 4294901760, %v1708_v32  ;;  %v3728_v48 = vpack.c.bf16 %v1695_v42, %v1688_v4 }
  0x85   : > { %3713 = vmatprep.subr.bf16.mxu0 %v4835_v19  ;;  %v1723_v42 = vand.u32 4294901760, %v1722_v47  ;;  %v5417_v32 = vand.u32 4294901760, %v4794_v39  ;;  %v5418_v14 = vand.u32 4294901760, %v4796_v12 }
  0x87   : > { %3427 = vmatpush3.bf16.msra.mxu1 %v5401_v31  ;;  %v1729_v11 = vsub.f32 %v4794_v39, %v5417_v32  ;;  %v1736_v53 = vsub.f32 %v4796_v12, %v5418_v14 }
  0x88   : > { %3715 = vmatpush3.bf16.msra.mxu0 %v4835_v19  ;;  %3429 = vmatprep.subr.bf16.mxu1 %v4323_v6  ;;  %v4909_v19 = vpack.c.bf16 %v1777_v9, %v1770_v63 }
  0x89   : > { %3717 = vmatprep.subr.bf16.mxu0 %v4862_v60 }
  0x8a   : > { %5413 = vst [vmem:[#allocation18_spill] sm:$0xff] %v4909_v19  ;;  %v1715_v19 = vsub.f32 %v4770_v13, %v5414_v40  ;;  %v5421_v40 = vand.u32 4294901760, %v4845_v62 }
  0x8b   : > { %3431 = vmatpush3.bf16.msra.mxu1 %v4323_v6 }
  0x8c   : > { %3719 = vmatpush3.bf16.msra.mxu0 %v4862_v60  ;;  %3433 = vmatprep.subr.bf16.mxu1 %v5410_v7  ;;  %v1702_v60 = vand.u32 4294901760, %v1701_v33  ;;  %v1716_v4 = vand.u32 4294901760, %v1715_v19  ;;  %v1730_v33 = vand.u32 4294901760, %v1729_v11  ;;  %v1757_v47 = vsub.f32 %v4845_v62, %v5421_v40  ;;  %v5449_v40 = vld [vmem:[#allocation19_spill] sm:$0xff] }
  0x8d   : > { %3721 = vmatprep.subr.bf16.mxu0 %v4880_v58  ;;  %v1778_v11 = vsub.f32 %v4874_v46, %v1777_v9 }
  0x8e   : > { %v3732_v36 = vpack.c.bf16 %v1709_v41, %v1702_v60  ;;  %v3736_v60 = vpack.c.bf16 %v1723_v42, %v1716_v4  ;;  %v1771_v42 = vsub.f32 %v4872_v37, %v1770_v63 }
  0x8f   : > { %3435 = vmatpush3.bf16.msra.mxu1 %v5410_v7 }
  0x90   : > { %3723 = vmatpush3.bf16.msra.mxu0 %v4880_v58  ;;  %3437 = vmatprep.subr.bf16.mxu1 %v4598_v23 }
  0x91   : > { %3725 = vmatprep.subr.bf16.mxu0 %v3724_v57 }
  0x92   : > { %2816 = vmatmul.mubr.f32.vlgmr.msra.gmra.mrb[0].mxu1 %v5416_v17  ;;  %v5422_v17 = vand.u32 4294901760, %v4847_v61 }
  0x93   : > { %3439 = vmatpush3.bf16.msra.mxu1 %v4598_v23  ;;  %3131 = vmatmul.mubr.f32.vlgmr.msra.gmra.mrb[0].mxu0 %v1663_v49  ;;  %v5419_v23 = vand.u32 4294901760, %v4819_v0  ;;  %v1737_v49 = vand.u32 4294901760, %v1736_v53  ;;  %v1772_v53 = vand.u32 4294901760, %v1771_v42 }
  0x94   : > { %3727 = vmatpush3.bf16.msra.mxu0 %v3724_v57  ;;  %3441 = vmatprep.subr.bf16.mxu1 %v4604_v18  ;;  %v5420_v57 = vand.u32 4294901760, %v4821_v24  ;;  %v1764_v32 = vsub.f32 %v4847_v61, %v5422_v17 }
  0x95   : > { %3729 = vmatprep.subr.bf16.mxu0 %v3728_v48  ;;  %2850 = vmatprep.mubr.f32.mxu1 %v4176_v54  ;;  %v1743_v50 = vsub.f32 %v4819_v0, %v5419_v23  ;;  %v3740_v41 = vpack.c.bf16 %v1737_v49, %v1730_v33 }
  0x96   : > { %3165 = vmatprep.mubr.f32.mxu0 %v4674_v43  ;;  %v1750_v19 = vsub.f32 %v4821_v24, %v5420_v57  ;;  %v1765_v4 = vand.u32 4294901760, %v1764_v32 }
  0x97   : > { %3443 = vmatpush3.bf16.msra.mxu1 %v4604_v18 }
  0x98   : > { %3731 = vmatpush3.bf16.msra.mxu0 %v3728_v48  ;;  %3445 = vmatprep.subr.bf16.mxu1 %v4616_v15  ;;  %v1744_v48 = vand.u32 4294901760, %v1743_v50  ;;  %v1751_v18 = vand.u32 4294901760, %v1750_v19  ;;  %v5443_v50 = vld [vmem:[#allocation20_spill] sm:$0xff] }
  0x99   : > { %3733 = vmatprep.subr.bf16.mxu0 %v3732_v36  ;;  %v5444_v57 = vand.u32 4294901760, %v5443_v50 }
  0x9b   : > { %3447 = vmatpush3.bf16.msra.mxu1 %v4616_v15  ;;  %v3744_v15 = vpack.c.bf16 %v1751_v18, %v1744_v48  ;;  %v959_v19 = vsub.f32 %v5443_v50, %v5444_v57  ;;  %v5447_v48 = vld [vmem:[#allocation24_spill] sm:$0xff]  ;;  %v5467_v57 = vld [vmem:[#allocation31_spill] sm:$0xff] }
  0x9c   : > { %3735 = vmatpush3.bf16.msra.mxu0 %v3732_v36  ;;  %3449 = vmatprep.subr.bf16.mxu1 %v4626_v26  ;;  %v1758_v36 = vand.u32 4294901760, %v1757_v47  ;;  %v5448_v18 = vand.u32 4294901760, %v5447_v48 }
  0x9d   : > { %3737 = vmatprep.subr.bf16.mxu0 %v3736_v60 }
  0x9e   : > { %v3748_v14 = vpack.c.bf16 %v1765_v4, %v1758_v36 }
  0x9f   : > { %3451 = vmatpush3.bf16.msra.mxu1 %v4626_v26  ;;  %v1779_v26 = vand.u32 4294901760, %v1778_v11  ;;  %v5450_v11 = vld [vmem:[#allocation25_spill] sm:$0xff] }
  0xa0   : > { %3739 = vmatpush3.bf16.msra.mxu0 %v3736_v60  ;;  %3453 = vmatprep.subr.bf16.mxu1 %v4634_v29  ;;  %v5445_v60 = vld [vmem:[#allocation23_spill] sm:$0xff] }
  0xa1   : > { %3741 = vmatprep.subr.bf16.mxu0 %v3740_v41  ;;  %v3752_v23 = vpack.c.bf16 %v1779_v26, %v1772_v53  ;;  %v5446_v33 = vand.u32 4294901760, %v5445_v60  ;;  %v5452_v26 = vld [vmem:[#allocation26_spill] sm:$0xff] }
  0xa3   : > { %3455 = vmatpush3.bf16.msra.mxu1 %v4634_v29  ;;  %v3756_v29 = vpack.c.bf16 %v4702_v1, %v4700_v44  ;;  %v3776_v44 = vpack.c.bf16 %v4821_v24, %v4819_v0  ;;  %v3780_v1 = vpack.c.bf16 %v4847_v61, %v4845_v62  ;;  %v5423_v24 = vld [vmem:[#allocation10_spill] sm:$0xff]  ;;  %v5429_v62 = vld [vmem:[#allocation9_spill] sm:$0xff]  ;;  %v998_v49 = vsub.f32 %v5445_v60, %v5446_v33 }
  0xa4   : > { %3743 = vmatpush3.bf16.msra.mxu0 %v3740_v41  ;;  %3457 = vmatprep.subr.bf16.mxu1 %v4640_v21  ;;  %v1005_v41 = vsub.f32 %v5447_v48, %v5448_v18 }
  0xa5   : > { %3745 = vmatprep.subr.bf16.mxu0 %v3744_v15  ;;  %v999_v36 = vand.u32 4294901760, %v998_v49  ;;  %v5469_v49 = vld [vmem:[#allocation32_spill] sm:$0xff] }
  0xa6   : > { %v1006_v4 = vand.u32 4294901760, %v1005_v41  ;;  %v5470_v18 = vand.u32 4294901760, %v5469_v49 }
  0xa7   : > { %3459 = vmatpush3.bf16.msra.mxu1 %v4640_v21  ;;  %v3760_v21 = vpack.c.bf16 %v4721_v56, %v4714_v34  ;;  %v5424_v34 = vand.u32 4294901760, %v5423_v24 }
  0xa8   : > { %3747 = vmatpush3.bf16.msra.mxu0 %v3744_v15  ;;  %3461 = vmatprep.subr.bf16.mxu1 %v4648_v3  ;;  %v960_v15 = vand.u32 4294901760, %v959_v19  ;;  %v5468_v19 = vand.u32 4294901760, %v5467_v57  ;;  %v1061_v41 = vsub.f32 %v5469_v49, %v5470_v18 }
  0xa9   : > { %3749 = vmatprep.subr.bf16.mxu0 %v3748_v14  ;;  %v949_v56 = vsub.f32 %v5423_v24, %v5424_v34 }
  0xaa   : > { %v1054_v33 = vsub.f32 %v5467_v57, %v5468_v19 }
  0xab   : > { %3463 = vmatpush3.bf16.msra.mxu1 %v4648_v3  ;;  %v3764_v3 = vpack.c.bf16 %v4745_v5, %v4743_v20  ;;  %v950_v61 = vand.u32 4294901760, %v949_v56  ;;  %v5436_v5 = vld [vmem:[#allocation37_spill] sm:$0xff]  ;;  %v5458_v56 = vld [vmem:[#allocation28_spill] sm:$0xff] }
  0xac   : > { %3751 = vmatpush3.bf16.msra.mxu0 %v3748_v14  ;;  %3465 = vmatprep.subr.bf16.mxu1 %v4656_v16  ;;  %v5451_v14 = vand.u32 4294901760, %v5450_v11 }
  0xad   : > { %3753 = vmatprep.subr.bf16.mxu0 %v3752_v23 }
  0xae   : > { %v1012_v53 = vsub.f32 %v5450_v11, %v5451_v14 }
  0xaf   : > { %3467 = vmatpush3.bf16.msra.mxu1 %v4656_v16  ;;  %v3768_v16 = vpack.c.bf16 %v4772_v2, %v4770_v13  ;;  %v5434_v13 = vld [vmem:[#allocation15_spill] sm:$0xff] }
  0xb0   : > { %3755 = vmatpush3.bf16.msra.mxu0 %v3752_v23  ;;  %3469 = vmatprep.subr.bf16.mxu1 %v5385_v59  ;;  %v5453_v23 = vand.u32 4294901760, %v5452_v26 }
  0xb1   : > { %3757 = vmatprep.subr.bf16.mxu0 %v3756_v29 }
  0xb2   : > { %2851 = vmatmul.mubr.f32.vlgmr.msra.gmra.mrb[0].mxu1 %v4233_v45 }
  0xb3   : > { %3471 = vmatpush3.bf16.msra.mxu1 %v5385_v59  ;;  %3166 = vmatmul.mubr.f32.vlgmr.msra.gmra.mrb[0].mxu0 %v4824_v8 }
  0xb4   : > { %3759 = vmatpush3.bf16.msra.mxu0 %v3756_v29  ;;  %3473 = vmatprep.subr.bf16.mxu1 %v5388_v38  ;;  %v1019_v29 = vsub.f32 %v5452_v26, %v5453_v23  ;;  %v5476_v23 = vld [vmem:[#allocation8_spill] sm:$0xff] }
  0xb5   : > { %3761 = vmatprep.subr.bf16.mxu0 %v3760_v21  ;;  %2885 = vmatprep.mubr.f32.mxu1 %v4176_v54  ;;  %v3772_v54 = vpack.c.bf16 %v4796_v12, %v4794_v39  ;;  %v3784_v39 = vpack.c.bf16 %v4874_v46, %v4872_v37  ;;  %v5425_v37 = vand.u32 4294901760, %v4687_v27  ;;  %v5431_v46 = vld [vmem:[#allocation12_spill] sm:$0xff]  ;;  %v5435_v12 = vand.u32 4294901760, %v5434_v13 }
  0xb6   : > { %3200 = vmatprep.mubr.f32.mxu0 %v4687_v27 }
  0xb7   : > { %3475 = vmatpush3.bf16.msra.mxu1 %v5388_v38  ;;  %v977_v20 = vsub.f32 %v5434_v13, %v5435_v12  ;;  %v5437_v38 = vld [vmem:[#allocation16_spill] sm:$0xff] }
  0xb8   : > { %3763 = vmatpush3.bf16.msra.mxu0 %v3760_v21  ;;  %3477 = vmatprep.subr.bf16.mxu1 %v5392_v25  ;;  %v5454_v21 = vld [vmem:[#allocation2_spill] sm:$0xff] }
  0xb9   : > { %3765 = vmatprep.subr.bf16.mxu0 %v3764_v3  ;;  %v978_v2 = vand.u32 4294901760, %v977_v20 }
  0xbb   : > { %3479 = vmatpush3.bf16.msra.mxu1 %v5392_v25  ;;  %v5438_v25 = vld [vmem:[#allocation21_spill] sm:$0xff] }
  0xbc   : > { %3767 = vmatpush3.bf16.msra.mxu0 %v3764_v3  ;;  %3481 = vmatprep.subr.bf16.mxu1 %v5395_v10  ;;  %v5455_v3 = vand.u32 4294901760, %v4851_v55 }
  0xbd   : > { %3769 = vmatprep.subr.bf16.mxu0 %v3768_v16 }
  0xbf   : > { %3483 = vmatpush3.bf16.msra.mxu1 %v5395_v10  ;;  %v5439_v10 = vand.u32 4294901760, %v5438_v25 }
  0xc0   : > { %3771 = vmatpush3.bf16.msra.mxu0 %v3768_v16  ;;  %3485 = vmatprep.subr.bf16.mxu1 %v5398_v30  ;;  %v3540_v16 = vpack.c.bf16 %v1006_v4, %v999_v36 }
  0xc1   : > { %3773 = vmatprep.subr.bf16.mxu0 %v3772_v54 }
  0xc3   : > { %3487 = vmatpush3.bf16.msra.mxu1 %v5398_v30  ;;  %v984_v30 = vsub.f32 %v5438_v25, %v5439_v10  ;;  %v5466_v10 = vld [vmem:[#allocation4_spill] sm:$0xff] }
  0xc4   : > { %3775 = vmatpush3.bf16.msra.mxu0 %v3772_v54  ;;  %3489 = vmatprep.subr.bf16.mxu1 %v5401_v31  ;;  %v1013_v54 = vand.u32 4294901760, %v1012_v53 }
  0xc5   : > { %3777 = vmatprep.subr.bf16.mxu0 %v3776_v44  ;;  %v985_v17 = vand.u32 4294901760, %v984_v30 }
  0xc7   : > { %3491 = vmatpush3.bf16.msra.mxu1 %v5401_v31  ;;  %v5440_v31 = vld [vmem:[#allocation22_spill] sm:$0xff] }
  0xc8   : > { %3779 = vmatpush3.bf16.msra.mxu0 %v3776_v44  ;;  %3493 = vmatprep.subr.bf16.mxu1 %v4323_v6  ;;  %v5441_v63 = vand.u32 4294901760, %v5440_v31  ;;  %v1020_v44 = vand.u32 4294901760, %v1019_v29 }
  0xc9   : > { %3781 = vmatprep.subr.bf16.mxu0 %v3780_v1 }
  0xca   : > { %v991_v9 = vsub.f32 %v5440_v31, %v5441_v63 }
  0xcb   : > { %3495 = vmatpush3.bf16.msra.mxu1 %v4323_v6  ;;  %v5428_v6 = vld [vmem:[#allocation35_spill] sm:$0xff] }
  0xcc   : > { %3783 = vmatpush3.bf16.msra.mxu0 %v3780_v1  ;;  %3497 = vmatprep.subr.bf16.mxu1 %v5410_v7  ;;  %v992_v32 = vand.u32 4294901760, %v991_v9  ;;  %v5456_v1 = vld [vmem:[#allocation27_spill] sm:$0xff] }
  0xcd   : > { %3785 = vmatprep.subr.bf16.mxu0 %v3784_v39 }
  0xce   : > { %v3536_v42 = vpack.c.bf16 %v992_v32, %v985_v17  ;;  %v1055_v17 = vand.u32 4294901760, %v1054_v33  ;;  %v1062_v32 = vand.u32 4294901760, %v1061_v41 }
  0xcf   : > { %3499 = vmatpush3.bf16.msra.mxu1 %v5410_v7  ;;  %v5442_v7 = vld [vmem:[#allocation38_spill] sm:$0xff] }
  0xd0   : > { %3787 = vmatpush3.bf16.msra.mxu0 %v3784_v39  ;;  %3501 = vmatprep.subr.bf16.mxu1 %v4043_v22  ;;  %v5457_v39 = vand.u32 4294901760, %v5456_v1  ;;  %v3556_v29 = vpack.c.bf16 %v1062_v32, %v1055_v17 }
  0xd1   : > { %3789 = vmatprep.subr.bf16.mxu0 %v4706_v52 }
  0xd2   : > { %2886 = vmatmul.mubr.f32.vlgmr.msra.gmra.mrb[0].mxu1 %v4233_v45  ;;  %v5426_v45 = vld [vmem:[#allocation3_spill] sm:$0xff]  ;;  %v1026_v34 = vsub.f32 %v5456_v1, %v5457_v39 }
  0xd3   : > { %3503 = vmatpush3.bf16.msra.mxu1 %v4043_v22  ;;  %3201 = vmatmul.mubr.f32.vlgmr.msra.gmra.mrb[0].mxu0 %v4851_v55  ;;  %v5427_v22 = vld [vmem:[#allocation6_spill] sm:$0xff]  ;;  %v5462_v55 = vld [vmem:[#allocation29_spill] sm:$0xff] }
  0xd4   : > { %3791 = vmatpush3.bf16.msra.mxu0 %v4706_v52  ;;  %3505 = vmatprep.subr.bf16.mxu1 %v4074_v28 }
  0xd5   : > { %3793 = vmatprep.subr.bf16.mxu0 %v4732_v51  ;;  %2920 = vmatprep.mubr.f32.mxu1 %v950_v61  ;;  %v5459_v61 = vand.u32 4294901760, %v5458_v56 }
  0xd6   : > { %3235 = vmatprep.mubr.f32.mxu0 %v5425_v37 }
  0xd7   : > { %3507 = vmatpush3.bf16.msra.mxu1 %v4074_v28  ;;  %v5430_v28 = vld [vmem:[#allocation36_spill] sm:$0xff]  ;;  %v1033_v37 = vsub.f32 %v5458_v56, %v5459_v61  ;;  %v3568_v61 = vpack.c.bf16 %v5440_v31, %v5438_v25 }
  0xd8   : > { %3795 = vmatpush3.bf16.msra.mxu0 %v4732_v51  ;;  %3509 = vmatprep.subr.bf16.mxu1 %v4105_v35 }
  0xd9   : > { %3797 = vmatprep.subr.bf16.mxu0 %v5426_v45 }
  0xdb   : > { %3511 = vmatpush3.bf16.msra.mxu1 %v4105_v35  ;;  %v5432_v35 = vld [vmem:[#allocation13_spill] sm:$0xff] }
  0xdc   : > { %3799 = vmatpush3.bf16.msra.mxu0 %v5426_v45  ;;  %3513 = vmatprep.subr.bf16.mxu1 %v5427_v22  ;;  %v5433_v27 = vand.u32 4294901760, %v5432_v35  ;;  %v3564_v39 = vpack.c.bf16 %v5434_v13, %v5432_v35  ;;  %v3576_v13 = vpack.c.bf16 %v5452_v26, %v5450_v11 }
  0xdd   : > { %3801 = vmatprep.subr.bf16.mxu0 %v5428_v6 }
  0xde   : > { %v970_v59 = vsub.f32 %v5432_v35, %v5433_v27  ;;  %v3572_v35 = vpack.c.bf16 %v5447_v48, %v5445_v60 }
  0xdf   : > { %3515 = vmatpush3.bf16.msra.mxu1 %v5427_v22  ;;  %v5460_v22 = vld [vmem:[#allocation14_spill] sm:$0xff] }
  0xe0   : > { %3803 = vmatpush3.bf16.msra.mxu0 %v5428_v6  ;;  %3517 = vmatprep.subr.bf16.mxu1 %v5429_v62  ;;  %v971_v0 = vand.u32 4294901760, %v970_v59  ;;  %v5464_v59 = vld [vmem:[#allocation30_spill] sm:$0xff] }
  0xe1   : > { %3805 = vmatprep.subr.bf16.mxu0 %v5430_v28  ;;  %v5465_v12 = vand.u32 4294901760, %v5464_v59 }
  0xe2   : > { %v3532_v47 = vpack.c.bf16 %v978_v2, %v971_v0  ;;  %v1027_v0 = vand.u32 4294901760, %v1026_v34  ;;  %v1034_v2 = vand.u32 4294901760, %v1033_v37  ;;  %v5479_v34 = vld [vmem:[#allocation18_spill] sm:$0xff]  ;;  %v5480_v37 = vld [vmem:[#allocation17_spill] sm:$0xff] }
  0xe3   : > { %3519 = vmatpush3.bf16.msra.mxu1 %v5429_v62  ;;  %v5461_v62 = vld [vmem:[#allocation7_spill] sm:$0xff]  ;;  %v1047_v20 = vsub.f32 %v5464_v59, %v5465_v12 }
  0xe4   : > { %3807 = vmatpush3.bf16.msra.mxu0 %v5430_v28  ;;  %3521 = vmatprep.subr.bf16.mxu1 %v5431_v46  ;;  %v3548_v9 = vpack.c.bf16 %v1034_v2, %v1027_v0 }
  0xe5   : > { %3809 = vmatprep.subr.bf16.mxu0 %v5436_v5  ;;  %v1048_v63 = vand.u32 4294901760, %v1047_v20 }
  0xe7   : > { %3523 = vmatpush3.bf16.msra.mxu1 %v5431_v46  ;;  %v5463_v46 = vand.u32 4294901760, %v5462_v55 }
  0xe8   : > { %3811 = vmatpush3.bf16.msra.mxu0 %v5436_v5  ;;  %3525 = vmatprep.subr.bf16.mxu1 %v5437_v38 }
  0xe9   : > { %3813 = vmatprep.subr.bf16.mxu0 %v5442_v7  ;;  %v1040_v27 = vsub.f32 %v5462_v55, %v5463_v46 }
  0xeb   : > { %3527 = vmatpush3.bf16.msra.mxu1 %v5437_v38  ;;  %v3544_v38 = vpack.c.bf16 %v1020_v44, %v1013_v54  ;;  %v1041_v30 = vand.u32 4294901760, %v1040_v27  ;;  %v5478_v44 = vld [vmem:[#allocation39_spill] sm:$0xff] }
  0xec   : > { %3815 = vmatpush3.bf16.msra.mxu0 %v5442_v7  ;;  %3529 = vmatprep.subr.bf16.mxu1 %v5449_v40 }
  0xed   : > { %3817 = vmatprep.subr.bf16.mxu0 %v4880_v58 }
  0xef   : > { %3531 = vmatpush3.bf16.msra.mxu1 %v5449_v40  ;;  %v5471_v40 = vld [vmem:[#allocation5_spill] sm:$0xff] }
  0xf0   : > { %3819 = vmatpush3.bf16.msra.mxu0 %v4880_v58  ;;  %3533 = vmatprep.subr.bf16.mxu1 %v3532_v47 }
  0xf1   : > { %3821 = vmatprep.subr.bf16.mxu0 %v5454_v21 }
  0xf2   : > { %2921 = vmatmul.mubr.f32.vlgmr.msra.gmra.mrb[0].mxu1 %v960_v15  ;;  %v5472_v15 = vld [vmem:[#allocation33_spill] sm:$0xff] }
  0xf3   : > { %3535 = vmatpush3.bf16.msra.mxu1 %v3532_v47  ;;  %3236 = vmatmul.mubr.f32.vlgmr.msra.gmra.mrb[0].mxu0 %v5455_v3  ;;  %v3552_v47 = vpack.c.bf16 %v1048_v63, %v1041_v30  ;;  %v5473_v36 = vand.u32 4294901760, %v5472_v15 }
  0xf4   : > { %3823 = vmatpush3.bf16.msra.mxu0 %v5454_v21  ;;  %3537 = vmatprep.subr.bf16.mxu1 %v3536_v42 }
  0xf5   : > { %3825 = vmatprep.subr.bf16.mxu0 %v5460_v22  ;;  %2955 = vmatprep.mubr.f32.mxu1 %v5461_v62  ;;  %v1068_v4 = vsub.f32 %v5472_v15, %v5473_v36 }
  0xf6   : > { %3270 = vmatprep.mubr.f32.mxu0 %v4674_v43 }
  0xf7   : > { %3539 = vmatpush3.bf16.msra.mxu1 %v3536_v42  ;;  %v5474_v42 = vld [vmem:[#allocation34_spill] sm:$0xff]  ;;  %v1069_v21 = vand.u32 4294901760, %v1068_v4 }
  0xf8   : > { %3827 = vmatpush3.bf16.msra.mxu0 %v5460_v22  ;;  %3541 = vmatprep.subr.bf16.mxu1 %v3540_v16  ;;  %v5475_v14 = vand.u32 4294901760, %v5474_v42 }
  0xf9   : > { %3829 = vmatprep.subr.bf16.mxu0 %v5466_v10 }
  0xfa   : > { %v1075_v53 = vsub.f32 %v5474_v42, %v5475_v14 }
  0xfb   : > { %3543 = vmatpush3.bf16.msra.mxu1 %v3540_v16  ;;  %v5477_v16 = vld [vmem:[#allocation11_spill] sm:$0xff] }
  0xfc   : > { %3831 = vmatpush3.bf16.msra.mxu0 %v5466_v10  ;;  %3545 = vmatprep.subr.bf16.mxu1 %v3544_v38  ;;  %v1076_v3 = vand.u32 4294901760, %v1075_v53 }
  0xfd   : > { %3833 = vmatprep.subr.bf16.mxu0 %v5471_v40 }
  0xfe   : > { %v3560_v54 = vpack.c.bf16 %v1076_v3, %v1069_v21 }
  0xff   : > { %3547 = vmatpush3.bf16.msra.mxu1 %v3544_v38 }
 0x100   : > { %3835 = vmatpush3.bf16.msra.mxu0 %v5471_v40  ;;  %3549 = vmatprep.subr.bf16.mxu1 %v3548_v9 }
 0x101   : > { %3837 = vmatprep.subr.bf16.mxu0 %v5476_v23 }
 0x103   : > { %3551 = vmatpush3.bf16.msra.mxu1 %v3548_v9 }
 0x104   : > { %3839 = vmatpush3.bf16.msra.mxu0 %v5476_v23  ;;  %3553 = vmatprep.subr.bf16.mxu1 %v3552_v47 }
 0x105   : > { %3841 = vmatprep.subr.bf16.mxu0 %v5477_v16 }
 0x107   : > { %3555 = vmatpush3.bf16.msra.mxu1 %v3552_v47 }
 0x108   : > { %3843 = vmatpush3.bf16.msra.mxu0 %v5477_v16  ;;  %3557 = vmatprep.subr.bf16.mxu1 %v3556_v29 }
 0x109   : > { %3845 = vmatprep.subr.bf16.mxu0 %v5478_v44 }
 0x10b   : > { %3559 = vmatpush3.bf16.msra.mxu1 %v3556_v29 }
 0x10c   : > { %3847 = vmatpush3.bf16.msra.mxu0 %v5478_v44  ;;  %3561 = vmatprep.subr.bf16.mxu1 %v3560_v54 }
 0x10d   : > { %3849 = vmatprep.subr.bf16.mxu0 %v5479_v34 }
 0x10f   : > { %3563 = vmatpush3.bf16.msra.mxu1 %v3560_v54 }
 0x110   : > { %3851 = vmatpush3.bf16.msra.mxu0 %v5479_v34  ;;  %3565 = vmatprep.subr.bf16.mxu1 %v3564_v39 }
 0x111   : > { %3853 = vmatprep.subr.bf16.mxu0 %v4706_v52 }
 0x112   : > { %2956 = vmatmul.mubr.f32.vlgmr.msra.gmra.mrb[0].mxu1 %v5480_v37 }
 0x113   : > { %3567 = vmatpush3.bf16.msra.mxu1 %v3564_v39  ;;  %3271 = vmatmul.mubr.f32.vlgmr.msra.gmra.mrb[0].mxu0 %v4824_v8 }
 0x114   : > { %3855 = vmatpush3.bf16.msra.mxu0 %v4706_v52  ;;  %3569 = vmatprep.subr.bf16.mxu1 %v3568_v61  ;;  %v3580_v52 = vpack.c.bf16 %v5458_v56, %v5456_v1 }
 0x115   : > { %3857 = vmatprep.subr.bf16.mxu0 %v4732_v51  ;;  %2990 = vmatprep.mubr.f32.mxu1 %v5423_v24  ;;  %v3592_v24 = vpack.c.bf16 %v5474_v42, %v5472_v15 }
 0x116   : > { %3305 = vmatprep.mubr.f32.mxu0 %v4674_v43  ;;  %v3584_v43 = vpack.c.bf16 %v5464_v59, %v5462_v55 }
 0x117   : > { %3571 = vmatpush3.bf16.msra.mxu1 %v3568_v61 }
 0x118   : > { %3859 = vmatpush3.bf16.msra.mxu0 %v4732_v51  ;;  %3573 = vmatprep.subr.bf16.mxu1 %v3572_v35  ;;  %v3588_v51 = vpack.c.bf16 %v5469_v49, %v5467_v57 }
 0x119   : > { %3861 = vmatprep.subr.bf16.mxu0 %v5426_v45 }
 0x11b   : > { %3575 = vmatpush3.bf16.msra.mxu1 %v3572_v35 }
 0x11c   : > { %3863 = vmatpush3.bf16.msra.mxu0 %v5426_v45  ;;  %3577 = vmatprep.subr.bf16.mxu1 %v3576_v13 }
 0x11d   : > { %3865 = vmatprep.subr.bf16.mxu0 %v5428_v6 }
 0x11f   : > { %3579 = vmatpush3.bf16.msra.mxu1 %v3576_v13 }
 0x120   : > { %3867 = vmatpush3.bf16.msra.mxu0 %v5428_v6  ;;  %3581 = vmatprep.subr.bf16.mxu1 %v3580_v52 }
 0x121   : > { %3869 = vmatprep.subr.bf16.mxu0 %v5430_v28 }
 0x123   : > { %3583 = vmatpush3.bf16.msra.mxu1 %v3580_v52 }
 0x124   : > { %3871 = vmatpush3.bf16.msra.mxu0 %v5430_v28  ;;  %3585 = vmatprep.subr.bf16.mxu1 %v3584_v43 }
 0x125   : > { %3873 = vmatprep.subr.bf16.mxu0 %v5436_v5 }
 0x127   : > { %3587 = vmatpush3.bf16.msra.mxu1 %v3584_v43 }
 0x128   : > { %3875 = vmatpush3.bf16.msra.mxu0 %v5436_v5  ;;  %3589 = vmatprep.subr.bf16.mxu1 %v3588_v51 }
 0x129   : > { %3877 = vmatprep.subr.bf16.mxu0 %v5442_v7 }
 0x12b   : > { %3591 = vmatpush3.bf16.msra.mxu1 %v3588_v51 }
 0x12c   : > { %3879 = vmatpush3.bf16.msra.mxu0 %v5442_v7  ;;  %3593 = vmatprep.subr.bf16.mxu1 %v3592_v24 }
 0x12d   : > { %3881 = vmatprep.subr.bf16.mxu0 %v4880_v58 }
 0x12f   : > { %3595 = vmatpush3.bf16.msra.mxu1 %v3592_v24 }
 0x130   : > { %3883 = vmatpush3.bf16.msra.mxu0 %v4880_v58 }
 0x132   : > { %2991 = vmatmul.mubr.f32.vlgmr.msra.gmra.mrb[0].mxu1 %v5443_v50 }
 0x133   : > { %3306 = vmatmul.mubr.f32.vlgmr.msra.gmra.mrb[0].mxu0 %v4824_v8 }
 0x205   : > { %v2992_v45 = vpop.f32.mrb[0].mxu1 }
 0x206   : > { %v3307_v6 = vpop.f32.mrb[0].mxu0  ;;  %v1223_v28 = vpop.f32.mrb[1].mxu1 }
 0x207   : > { %v3884_v5 = vadd.f32 %v3307_v6, %v2992_v45  ;;  %v2242_v25 = vpop.f32.mrb[1].mxu0 }
 0x208   : > { %v3885_v31 = vadd.f32 %v2242_v25, %v1223_v28 }
 0x209   : > { %2255 = vst [vmem:[%s143_s12 + $0x8] sm:$0xff] %v3884_v5 }
 0x20a   : > { %2254 = vst [vmem:[%s143_s12] sm:$0xff] %v3885_v31 }
 0x20b PF: > { %s12_s9 = sadd.s32 1, %s3933_s9  }
 0x20c   : > { %p9_p4 = scmp.ge.s32.totalorder %s12_s9, 4  }
 0x20e   :  { %11 = sbr.rel (!%p9_p4) target bundleno = 1 (0x1), region = 60 }

</bundles_post_ra>
